<compile_context>
chip_gen: v7x
topology: tpu7x:2x2x1
jax: 0.10.0
libtpu: 0.0.40
codegen_flags: <defaults>
</compile_context>

<pallas_src>
import jax
import jax.numpy as jnp
from jax.experimental import pallas as pl
from jax.experimental.pallas import tpu as pltpu


# ---------------------------------------------------------------------------
# helpers
# ---------------------------------------------------------------------------
def _round_up(x, m):
    return ((x + m - 1) // m) * m


def _pad2(a, rows, cols):
    return jnp.pad(a, ((0, rows - a.shape[0]), (0, cols - a.shape[1])))


# ---------------------------------------------------------------------------
# Pallas kernel: one batch tile of the whole VAE forward (6 matmuls, fused)
# ---------------------------------------------------------------------------
def _make_vae_kernel(d_pad):
    def kernel(
        x_ref, eps_ref,
        w_e1_ref, b_e1_ref, w_e2_ref, b_e2_ref,
        w_head_ref, b_head_ref,
        w_d1_ref, b_d1_ref, w_d2_ref, b_d2_ref, w_d3_ref, b_d3_ref,
        logits_ref, head_ref,
    ):
        def affine(a, w_ref, b_ref):
            # cast the activation to the weight dtype at the MXU boundary
            # (bf16 on the default path); accumulate + bias-add in f32.
            return jnp.dot(a.astype(w_ref.dtype), w_ref[...],
                           preferred_element_type=jnp.float32) + b_ref[...]

        x = x_ref[...]                                     # (T, IN_P)

        # --- encoder: Linear -> ReLU -> Linear -> ReLU
        h = jnp.maximum(affine(x, w_e1_ref, b_e1_ref), 0.0)
        h = jnp.maximum(affine(h, w_e2_ref, b_e2_ref), 0.0)    # (T, H_P) f32

        # --- fused mean|logvar head: single (H_P, 2*D_P) matmul, stored as
        #     one lane-dense (T, 2*D_P) output; wrapper splits mu / logvar.
        head = affine(h, w_head_ref, b_head_ref)           # (T, 2*D_P) f32
        mu = head[:, :d_pad]                               # 128-aligned slices
        logvar = head[:, d_pad:]

        # --- reparameterization (all f32 elementwise; exp goes to the EUP).
        # NOTE: padded lanes of eps MUST be zero: padded logvar lanes are 0 so
        # exp(0)=1, and only eps==0 keeps z's padded lanes at 0 before they hit
        # w_d1's zero-padded rows.
        z = mu + jnp.exp(0.5 * logvar) * eps_ref[...]      # (T, D_P) f32

        # --- decoder: Linear -> ReLU -> Linear -> ReLU -> Linear
        d = jnp.maximum(affine(z, w_d1_ref, b_d1_ref), 0.0)
        d = jnp.maximum(affine(d, w_d2_ref, b_d2_ref), 0.0)
        logits_ref[...] = affine(d, w_d3_ref, b_d3_ref)    # (T, IN_P) f32
        head_ref[...] = head

    return kernel


# ---------------------------------------------------------------------------
# Wrapper: pad to lane-dense shapes, tile batch, call kernel, slice outputs
# ---------------------------------------------------------------------------
def vae_forward(x_nxlxa, eps_nxd, params, *, matmul_dtype=jnp.bfloat16,
                tile_n=None):
    """x_nxlxa: (N, L, A) f32; eps_nxd: (N, D) f32. Returns (logits, mu, logvar)."""
    n, seq_len, a = x_nxlxa.shape
    in_dim = seq_len * a
    latent_dim = eps_nxd.shape[1]
    n_hidden = params["w_e1"].shape[1]

    # padded (lane-dense) dims
    in_p = _round_up(in_dim, 128)
    h_p = _round_up(n_hidden, 128)
    d_p = _round_up(latent_dim, 128)

    # ---- batch tiling: 16-aligned rows (bf16 sublane packing), at least two
    #      grid steps when possible (v7x: both TensorCores get work via the
    #      "parallel" axis), up to 256-row tiles to fill the MXU M dimension.
    if tile_n is None:
        align = 16
        n_al = _round_up(n, align)
        if n_al <= align:
            tile_n = align
        else:
            tile_n = min(256, _round_up((n_al + 1) // 2, align))
    n_p = _round_up(n, tile_n)
    grid_n = n_p // tile_n

    # ---- pad activations (zeros in padded rows/lanes); x one-hot is exactly
    #      representable in bf16. eps stays f32 (elementwise path) and MUST be
    #      zero in padded lanes (see kernel note).
    x_flat = x_nxlxa.reshape(n, in_dim).astype(jnp.float32)
    x_pad = _pad2(x_flat, n_p, in_p).astype(matmul_dtype)
    eps_pad = _pad2(eps_nxd.astype(jnp.float32), n_p, d_p)

    # ---- pad weights (zero pad -> padded lanes compute to exactly 0),
    #      fuse mu|logvar head, cast weights to matmul dtype (biases stay f32)
    def w(name, rows, cols):
        return _pad2(params[name], rows, cols).astype(matmul_dtype)

    def b(name, cols):
        return _pad2(params[name], 1, cols).astype(jnp.float32)

    w_e1 = w("w_e1", in_p, h_p);  b_e1 = b("b_e1", h_p)
    w_e2 = w("w_e2", h_p, h_p);   b_e2 = b("b_e2", h_p)
    w_head = jnp.concatenate([w("w_mu", h_p, d_p), w("w_lv", h_p, d_p)], axis=1)
    b_head = jnp.concatenate([b("b_mu", d_p), b("b_lv", d_p)], axis=1)
    w_d1 = w("w_d1", d_p, h_p);   b_d1 = b("b_d1", h_p)
    w_d2 = w("w_d2", h_p, h_p);   b_d2 = b("b_d2", h_p)
    w_d3 = w("w_d3", h_p, in_p);  b_d3 = b("b_d3", in_p)

    # ---- specs: batch-tiled activations/outputs, grid-invariant weights
    def build_specs(single_buffer_weights):
        def wspec(shape):
            if single_buffer_weights:
                # constant index_map => never re-DMA'd; single buffer halves
                # its resident VMEM footprint.
                return pl.BlockSpec(shape, lambda i: (0, 0),
                                    pipeline_mode=pl.Buffered(1))
            return pl.BlockSpec(shape, lambda i: (0, 0))

        in_specs = [
            pl.BlockSpec((tile_n, in_p), lambda i: (i, 0)),     # x
            pl.BlockSpec((tile_n, d_p), lambda i: (i, 0)),      # eps
            wspec((in_p, h_p)), wspec((1, h_p)),                # w_e1, b_e1
            wspec((h_p, h_p)), wspec((1, h_p)),                 # w_e2, b_e2
            wspec((h_p, 2 * d_p)), wspec((1, 2 * d_p)),         # w_head, b_head
            wspec((d_p, h_p)), wspec((1, h_p)),                 # w_d1, b_d1
            wspec((h_p, h_p)), wspec((1, h_p)),                 # w_d2, b_d2
            wspec((h_p, in_p)), wspec((1, in_p)),               # w_d3, b_d3
        ]
        out_specs = (
            pl.BlockSpec((tile_n, in_p), lambda i: (i, 0)),     # logits
            pl.BlockSpec((tile_n, 2 * d_p), lambda i: (i, 0)),  # mu|logvar head
        )
        return in_specs, out_specs

    # ---- VMEM budget: resident weights (assume worst-case double buffer) +
    #      double-buffered activation tiles, 25% headroom, 16..64 MiB clamp
    #      (64 MiB == v7x physical VMEM per TensorCore).
    w_itemsize = jnp.dtype(matmul_dtype).itemsize
    mm_elems = (in_p * h_p + h_p * h_p + h_p * 2 * d_p
                + d_p * h_p + h_p * h_p + h_p * in_p)
    bias_elems = 4 * h_p + 2 * d_p + in_p
    act_tile_bytes = (tile_n * in_p * w_itemsize        # x tile
                      + tile_n * d_p * 4                # eps tile
                      + tile_n * in_p * 4               # logits tile
                      + tile_n * 2 * d_p * 4)           # head tile
    vmem_need = 2 * (mm_elems * w_itemsize + bias_elems * 4) + 2 * act_tile_bytes
    vmem_limit = int(min(max(1.25 * vmem_need, 16 << 20), 64 << 20))

    # ---- cost estimate (advisory for XLA scheduling around the call)
    cost = pl.CostEstimate(
        flops=int(2 * n_p * mm_elems),
        transcendentals=int(n_p * d_p),
        bytes_accessed=int(
            w_itemsize * n_p * in_p + 4 * n_p * d_p      # x, eps in
            + 4 * (n_p * in_p + 2 * n_p * d_p)           # logits, head out
            + w_itemsize * mm_elems                      # weights
            + 4 * bias_elems                             # biases
        ),
    )

    def run(single_buffer_weights):
        in_specs, out_specs = build_specs(single_buffer_weights)
        return pl.pallas_call(
            _make_vae_kernel(d_p),
            out_shape=(
                jax.ShapeDtypeStruct((n_p, in_p), jnp.float32),
                jax.ShapeDtypeStruct((n_p, 2 * d_p), jnp.float32),
            ),
            grid_spec=pltpu.PrefetchScalarGridSpec(
                num_scalar_prefetch=0,
                grid=(grid_n,),
                in_specs=in_specs,
                out_specs=out_specs,
            ),
            compiler_params=pltpu.CompilerParams(
                dimension_semantics=("parallel",),   # megacore-shard batch
                vmem_limit_bytes=vmem_limit,
            ),
            cost_estimate=cost,
        )(
            x_pad, eps_pad,
            w_e1, b_e1, w_e2, b_e2, w_head, b_head,
            w_d1, b_d1, w_d2, b_d2, w_d3, b_d3,
        )

    try:
        logits_pad, head_pad = run(single_buffer_weights=True)
    except Exception:
        # Fallback for Pallas versions that reject pipeline_mode/Buffered(1):
        # identical semantics, default (double-buffered) weight specs.
        logits_pad, head_pad = run(single_buffer_weights=False)

    # ---- slice padding off before anything downstream (losses, softmax, ...)
    logits = logits_pad[:n, :in_dim].reshape(n, seq_len, a)
    mu = head_pad[:n, :latent_dim]
    logvar = head_pad[:n, d_p:d_p + latent_dim]
    return logits, mu, logvar


# ---------------------------------------------------------------------------
# Deterministic parameter init (PyTorch Linear-style uniform bounds)
# ---------------------------------------------------------------------------
def init_linear(key, fan_in, fan_out):
    k_w, k_b = jax.random.split(key)
    bound = 1.0 / jnp.sqrt(jnp.asarray(fan_in, jnp.float32))
    w = jax.random.uniform(k_w, (fan_in, fan_out), jnp.float32, -bound, bound)
    b = jax.random.uniform(k_b, (1, fan_out), jnp.float32, -bound, bound)
    return w, b


def init_params(key, seq_len, alphabet_size, n_hidden, latent_dim):
    keys = jax.random.split(key, 8)
    in_dim = seq_len * alphabet_size
    p = {}
    p["w_e1"], p["b_e1"] = init_linear(keys[0], in_dim, n_hidden)
    p["w_e2"], p["b_e2"] = init_linear(keys[1], n_hidden, n_hidden)
    p["w_mu"], p["b_mu"] = init_linear(keys[2], n_hidden, latent_dim)
    p["w_lv"], p["b_lv"] = init_linear(keys[3], n_hidden, latent_dim)
    p["w_d1"], p["b_d1"] = init_linear(keys[4], latent_dim, n_hidden)
    p["w_d2"], p["b_d2"] = init_linear(keys[5], n_hidden, n_hidden)
    p["w_d3"], p["b_d3"] = init_linear(keys[6], n_hidden, in_dim)
    return p


# ---------------------------------------------------------------------------
# Pure-JAX reference for correctness check
# ---------------------------------------------------------------------------
def vae_forward_ref(x_nxlxa, eps_nxd, p):
    n = x_nxlxa.shape[0]
    x = x_nxlxa.reshape(n, -1)
    h = jnp.maximum(x @ p["w_e1"] + p["b_e1"], 0.0)
    h = jnp.maximum(h @ p["w_e2"] + p["b_e2"], 0.0)
    mu = h @ p["w_mu"] + p["b_mu"]
    logvar = h @ p["w_lv"] + p["b_lv"]
    z = mu + jnp.exp(0.5 * logvar) * eps_nxd
    d = jnp.maximum(z @ p["w_d1"] + p["b_d1"], 0.0)
    d = jnp.maximum(d @ p["w_d2"] + p["b_d2"], 0.0)
    logits = d @ p["w_d3"] + p["b_d3"]
    return logits.reshape(x_nxlxa.shape), mu, logvar


# TODO(synk): torch.randn_like / fit() / generate() are host-side control and
# RNG; the noise is supplied by the wrapper instead of drawn in-kernel.
if __name__ == "__main__":
    # Small shapes consistent with the module: N=2 sequences of length 8 over
    # the RNA alphabet "ACGU" (4 symbols), latent_dim=10, n_hidden=20.
    N, SEQ_LEN, ALPHABET_SIZE = 2, 8, 4
    LATENT_DIM, N_HIDDEN = 10, 20

    key = jax.random.PRNGKey(0)
    k_params, k_x, k_eps = jax.random.split(key, 3)

    params = init_params(k_params, SEQ_LEN, ALPHABET_SIZE, N_HIDDEN, LATENT_DIM)

    # One-hot input (N, L, A), float32 (matches dtype=torch.float)
    idx = jax.random.randint(k_x, (N, SEQ_LEN), 0, ALPHABET_SIZE)
    x_nxlxa = jax.nn.one_hot(idx, ALPHABET_SIZE, dtype=jnp.float32)

    # Deterministic reparameterization noise (stands in for torch.randn_like)
    eps_nxd = jax.random.normal(k_eps, (N, LATENT_DIM), jnp.float32)

    logits_r, mu_r, logvar_r = vae_forward_ref(x_nxlxa, eps_nxd, params)

    # --- default path: bf16 MXU operands, f32 accumulation + f32 elementwise
    logits, mu, logvar = vae_forward(x_nxlxa, eps_nxd, params)
    jax.block_until_ready((logits, mu, logvar))
    assert logits.shape == (N, SEQ_LEN, ALPHABET_SIZE)
    assert mu.shape == (N, LATENT_DIM) and logvar.shape == (N, LATENT_DIM)
    assert jnp.allclose(logits, logits_r, atol=5e-2)
    assert jnp.allclose(mu, mu_r, atol=5e-2)
    assert jnp.allclose(logvar, logvar_r, atol=5e-2)

    # --- f32-operand path (accuracy check vs the PyTorch-style reference; at
    #     these small K the default-precision f32 matmul matches to ~1e-5).
    logits_f, mu_f, logvar_f = vae_forward(
        x_nxlxa, eps_nxd, params, matmul_dtype=jnp.float32)
    jax.block_until_ready((logits_f, mu_f, logvar_f))
    assert jnp.allclose(logits_f, logits_r, atol=1e-5)
    assert jnp.allclose(mu_f, mu_r, atol=1e-5)
    assert jnp.allclose(logvar_f, logvar_r, atol=1e-5)

    print("KERNEL_OK")
</pallas_src>

<mosaic_0001>
module attributes {stable_mosaic.version = 11 : i64} {
  func.func @kernel(%arg0: i32, %arg1: memref<16x128xbf16, #tpu.memory_space<vmem>>, %arg2: memref<16x128xf32, #tpu.memory_space<vmem>>, %arg3: memref<128x128xbf16, #tpu.memory_space<vmem>>, %arg4: memref<1x128xf32, #tpu.memory_space<vmem>>, %arg5: memref<128x128xbf16, #tpu.memory_space<vmem>>, %arg6: memref<1x128xf32, #tpu.memory_space<vmem>>, %arg7: memref<128x256xbf16, #tpu.memory_space<vmem>>, %arg8: memref<1x256xf32, #tpu.memory_space<vmem>>, %arg9: memref<128x128xbf16, #tpu.memory_space<vmem>>, %arg10: memref<1x128xf32, #tpu.memory_space<vmem>>, %arg11: memref<128x128xbf16, #tpu.memory_space<vmem>>, %arg12: memref<1x128xf32, #tpu.memory_space<vmem>>, %arg13: memref<128x128xbf16, #tpu.memory_space<vmem>>, %arg14: memref<1x128xf32, #tpu.memory_space<vmem>>, %arg15: memref<16x128xf32, #tpu.memory_space<vmem>>, %arg16: memref<16x256xf32, #tpu.memory_space<vmem>>) attributes {dimension_semantics = [#tpu.dimension_semantics<parallel>], iteration_bounds = array<i64: 1>, scalar_prefetch = 0 : i64, scratch_operands = 0 : i64, tpu.core_type = #tpu.core_type<tc>, window_params = [{transform_indices = @transform_0, window_bounds = array<i64: 16, 128>}, {transform_indices = @transform_1, window_bounds = array<i64: 16, 128>}, {pipeline_mode = #tpu.pipeline_mode<synchronous>, transform_indices = @transform_2, window_bounds = array<i64: 128, 128>}, {pipeline_mode = #tpu.pipeline_mode<synchronous>, transform_indices = @transform_3, window_bounds = array<i64: 1, 128>}, {pipeline_mode = #tpu.pipeline_mode<synchronous>, transform_indices = @transform_4, window_bounds = array<i64: 128, 128>}, {pipeline_mode = #tpu.pipeline_mode<synchronous>, transform_indices = @transform_5, window_bounds = array<i64: 1, 128>}, {pipeline_mode = #tpu.pipeline_mode<synchronous>, transform_indices = @transform_6, window_bounds = array<i64: 128, 256>}, {pipeline_mode = #tpu.pipeline_mode<synchronous>, transform_indices = @transform_7, window_bounds = array<i64: 1, 256>}, {pipeline_mode = #tpu.pipeline_mode<synchronous>, transform_indices = @transform_8, window_bounds = array<i64: 128, 128>}, {pipeline_mode = #tpu.pipeline_mode<synchronous>, transform_indices = @transform_9, window_bounds = array<i64: 1, 128>}, {pipeline_mode = #tpu.pipeline_mode<synchronous>, transform_indices = @transform_10, window_bounds = array<i64: 128, 128>}, {pipeline_mode = #tpu.pipeline_mode<synchronous>, transform_indices = @transform_11, window_bounds = array<i64: 1, 128>}, {pipeline_mode = #tpu.pipeline_mode<synchronous>, transform_indices = @transform_12, window_bounds = array<i64: 128, 128>}, {pipeline_mode = #tpu.pipeline_mode<synchronous>, transform_indices = @transform_13, window_bounds = array<i64: 1, 128>}, {transform_indices = @transform_14, window_bounds = array<i64: 16, 128>}, {transform_indices = @transform_15, window_bounds = array<i64: 16, 256>}]} {
    %c0 = arith.constant 0 : index
    %c0_0 = arith.constant 0 : index
    %0 = vector.load %arg1[%c0, %c0_0] : memref<16x128xbf16, #tpu.memory_space<vmem>>, vector<16x128xbf16>
    %c0_1 = arith.constant 0 : index
    %c0_2 = arith.constant 0 : index
    %1 = vector.load %arg3[%c0_1, %c0_2] : memref<128x128xbf16, #tpu.memory_space<vmem>>, vector<128x128xbf16>
    %cst = arith.constant dense<0.000000e+00> : vector<16x128xf32>
    %2 = tpu.matmul %0, %1, %cst {dimension_numbers = #tpu.dot_dimension_numbers<[1], [0], [0], [1], [0, 0, 1, 1], [], []>} : vector<16x128xbf16>, vector<128x128xbf16>, vector<16x128xf32> -> vector<16x128xf32>
    %c0_3 = arith.constant 0 : index
    %c0_4 = arith.constant 0 : index
    %3 = vector.load %arg4[%c0_3, %c0_4] : memref<1x128xf32, #tpu.memory_space<vmem>>, vector<1x128xf32>
    %4 = vector.broadcast %3 : vector<1x128xf32> to vector<16x128xf32>
    %5 = arith.addf %2, %4 : vector<16x128xf32>
    %cst_5 = arith.constant 0.000000e+00 : f32
    %6 = vector.broadcast %cst_5 : f32 to vector<16x128xf32>
    %7 = arith.maximumf %5, %6 : vector<16x128xf32>
    %8 = arith.truncf %7 : vector<16x128xf32> to vector<16x128xbf16>
    %c0_6 = arith.constant 0 : index
    %c0_7 = arith.constant 0 : index
    %9 = vector.load %arg5[%c0_6, %c0_7] : memref<128x128xbf16, #tpu.memory_space<vmem>>, vector<128x128xbf16>
    %cst_8 = arith.constant dense<0.000000e+00> : vector<16x128xf32>
    %10 = tpu.matmul %8, %9, %cst_8 {dimension_numbers = #tpu.dot_dimension_numbers<[1], [0], [0], [1], [0, 0, 1, 1], [], []>} : vector<16x128xbf16>, vector<128x128xbf16>, vector<16x128xf32> -> vector<16x128xf32>
    %c0_9 = arith.constant 0 : index
    %c0_10 = arith.constant 0 : index
    %11 = vector.load %arg6[%c0_9, %c0_10] : memref<1x128xf32, #tpu.memory_space<vmem>>, vector<1x128xf32>
    %12 = vector.broadcast %11 : vector<1x128xf32> to vector<16x128xf32>
    %13 = arith.addf %10, %12 : vector<16x128xf32>
    %cst_11 = arith.constant 0.000000e+00 : f32
    %14 = vector.broadcast %cst_11 : f32 to vector<16x128xf32>
    %15 = arith.maximumf %13, %14 : vector<16x128xf32>
    %16 = arith.truncf %15 : vector<16x128xf32> to vector<16x128xbf16>
    %c0_12 = arith.constant 0 : index
    %c0_13 = arith.constant 0 : index
    %17 = vector.load %arg7[%c0_12, %c0_13] : memref<128x256xbf16, #tpu.memory_space<vmem>>, vector<128x256xbf16>
    %cst_14 = arith.constant dense<0.000000e+00> : vector<16x256xf32>
    %18 = tpu.matmul %16, %17, %cst_14 {dimension_numbers = #tpu.dot_dimension_numbers<[1], [0], [0], [1], [0, 0, 1, 1], [], []>} : vector<16x128xbf16>, vector<128x256xbf16>, vector<16x256xf32> -> vector<16x256xf32>
    %c0_15 = arith.constant 0 : index
    %c0_16 = arith.constant 0 : index
    %19 = vector.load %arg8[%c0_15, %c0_16] : memref<1x256xf32, #tpu.memory_space<vmem>>, vector<1x256xf32>
    %20 = vector.broadcast %19 : vector<1x256xf32> to vector<16x256xf32>
    %21 = arith.addf %18, %20 : vector<16x256xf32>
    %22 = vector.extract_strided_slice %21 {offsets = [0, 0], sizes = [16, 128], strides = [1, 1]} : vector<16x256xf32> to vector<16x128xf32>
    %23 = vector.extract_strided_slice %21 {offsets = [0, 128], sizes = [16, 128], strides = [1, 1]} : vector<16x256xf32> to vector<16x128xf32>
    %cst_17 = arith.constant 5.000000e-01 : f32
    %24 = vector.broadcast %cst_17 : f32 to vector<16x128xf32>
    %25 = arith.mulf %24, %23 : vector<16x128xf32>
    %26 = math.exp %25 : vector<16x128xf32>
    %c0_18 = arith.constant 0 : index
    %c0_19 = arith.constant 0 : index
    %27 = vector.load %arg2[%c0_18, %c0_19] : memref<16x128xf32, #tpu.memory_space<vmem>>, vector<16x128xf32>
    %28 = arith.mulf %26, %27 : vector<16x128xf32>
    %29 = arith.addf %22, %28 : vector<16x128xf32>
    %30 = arith.truncf %29 : vector<16x128xf32> to vector<16x128xbf16>
    %c0_20 = arith.constant 0 : index
    %c0_21 = arith.constant 0 : index
    %31 = vector.load %arg9[%c0_20, %c0_21] : memref<128x128xbf16, #tpu.memory_space<vmem>>, vector<128x128xbf16>
    %cst_22 = arith.constant dense<0.000000e+00> : vector<16x128xf32>
    %32 = tpu.matmul %30, %31, %cst_22 {dimension_numbers = #tpu.dot_dimension_numbers<[1], [0], [0], [1], [0, 0, 1, 1], [], []>} : vector<16x128xbf16>, vector<128x128xbf16>, vector<16x128xf32> -> vector<16x128xf32>
    %c0_23 = arith.constant 0 : index
    %c0_24 = arith.constant 0 : index
    %33 = vector.load %arg10[%c0_23, %c0_24] : memref<1x128xf32, #tpu.memory_space<vmem>>, vector<1x128xf32>
    %34 = vector.broadcast %33 : vector<1x128xf32> to vector<16x128xf32>
    %35 = arith.addf %32, %34 : vector<16x128xf32>
    %cst_25 = arith.constant 0.000000e+00 : f32
    %36 = vector.broadcast %cst_25 : f32 to vector<16x128xf32>
    %37 = arith.maximumf %35, %36 : vector<16x128xf32>
    %38 = arith.truncf %37 : vector<16x128xf32> to vector<16x128xbf16>
    %c0_26 = arith.constant 0 : index
    %c0_27 = arith.constant 0 : index
    %39 = vector.load %arg11[%c0_26, %c0_27] : memref<128x128xbf16, #tpu.memory_space<vmem>>, vector<128x128xbf16>
    %cst_28 = arith.constant dense<0.000000e+00> : vector<16x128xf32>
    %40 = tpu.matmul %38, %39, %cst_28 {dimension_numbers = #tpu.dot_dimension_numbers<[1], [0], [0], [1], [0, 0, 1, 1], [], []>} : vector<16x128xbf16>, vector<128x128xbf16>, vector<16x128xf32> -> vector<16x128xf32>
    %c0_29 = arith.constant 0 : index
    %c0_30 = arith.constant 0 : index
    %41 = vector.load %arg12[%c0_29, %c0_30] : memref<1x128xf32, #tpu.memory_space<vmem>>, vector<1x128xf32>
    %42 = vector.broadcast %41 : vector<1x128xf32> to vector<16x128xf32>
    %43 = arith.addf %40, %42 : vector<16x128xf32>
    %cst_31 = arith.constant 0.000000e+00 : f32
    %44 = vector.broadcast %cst_31 : f32 to vector<16x128xf32>
    %45 = arith.maximumf %43, %44 : vector<16x128xf32>
    %46 = arith.truncf %45 : vector<16x128xf32> to vector<16x128xbf16>
    %c0_32 = arith.constant 0 : index
    %c0_33 = arith.constant 0 : index
    %47 = vector.load %arg13[%c0_32, %c0_33] : memref<128x128xbf16, #tpu.memory_space<vmem>>, vector<128x128xbf16>
    %cst_34 = arith.constant dense<0.000000e+00> : vector<16x128xf32>
    %48 = tpu.matmul %46, %47, %cst_34 {dimension_numbers = #tpu.dot_dimension_numbers<[1], [0], [0], [1], [0, 0, 1, 1], [], []>} : vector<16x128xbf16>, vector<128x128xbf16>, vector<16x128xf32> -> vector<16x128xf32>
    %c0_35 = arith.constant 0 : index
    %c0_36 = arith.constant 0 : index
    %49 = vector.load %arg14[%c0_35, %c0_36] : memref<1x128xf32, #tpu.memory_space<vmem>>, vector<1x128xf32>
    %50 = vector.broadcast %49 : vector<1x128xf32> to vector<16x128xf32>
    %51 = arith.addf %48, %50 : vector<16x128xf32>
    %c0_37 = arith.constant 0 : index
    %c0_38 = arith.constant 0 : index
    %52 = vector.load %arg15[%c0_37, %c0_38] : memref<16x128xf32, #tpu.memory_space<vmem>>, vector<16x128xf32>
    tpu.vector_store %arg15[%c0_37, %c0_38], %51 {strides = array<i32>} : memref<16x128xf32, #tpu.memory_space<vmem>>, vector<16x128xf32>,
    %c0_39 = arith.constant 0 : index
    %c0_40 = arith.constant 0 : index
    %53 = vector.load %arg16[%c0_39, %c0_40] : memref<16x256xf32, #tpu.memory_space<vmem>>, vector<16x256xf32>
    tpu.vector_store %arg16[%c0_39, %c0_40], %21 {strides = array<i32>} : memref<16x256xf32, #tpu.memory_space<vmem>>, vector<16x256xf32>,
    return
  }
  func.func @transform_0(%arg0: i32) -> (i32, i32) {
    %c0_i32 = arith.constant 0 : i32
    %c0_i32_0 = arith.constant 0 : i32
    return %arg0, %c0_i32 : i32, i32
  }
  func.func @transform_1(%arg0: i32) -> (i32, i32) {
    %c0_i32 = arith.constant 0 : i32
    %c0_i32_0 = arith.constant 0 : i32
    return %arg0, %c0_i32 : i32, i32
  }
  func.func @transform_2(%arg0: i32) -> (i32, i32) {
    %c0_i32 = arith.constant 0 : i32
    %c0_i32_0 = arith.constant 0 : i32
    %c0_i32_1 = arith.constant 0 : i32
    return %c0_i32, %c0_i32_0 : i32, i32
  }
  func.func @transform_3(%arg0: i32) -> (i32, i32) {
    %c0_i32 = arith.constant 0 : i32
    %c0_i32_0 = arith.constant 0 : i32
    %c0_i32_1 = arith.constant 0 : i32
    return %c0_i32, %c0_i32_0 : i32, i32
  }
  func.func @transform_4(%arg0: i32) -> (i32, i32) {
    %c0_i32 = arith.constant 0 : i32
    %c0_i32_0 = arith.constant 0 : i32
    %c0_i32_1 = arith.constant 0 : i32
    return %c0_i32, %c0_i32_0 : i32, i32
  }
  func.func @transform_5(%arg0: i32) -> (i32, i32) {
    %c0_i32 = arith.constant 0 : i32
    %c0_i32_0 = arith.constant 0 : i32
    %c0_i32_1 = arith.constant 0 : i32
    return %c0_i32, %c0_i32_0 : i32, i32
  }
  func.func @transform_6(%arg0: i32) -> (i32, i32) {
    %c0_i32 = arith.constant 0 : i32
    %c0_i32_0 = arith.constant 0 : i32
    %c0_i32_1 = arith.constant 0 : i32
    return %c0_i32, %c0_i32_0 : i32, i32
  }
  func.func @transform_7(%arg0: i32) -> (i32, i32) {
    %c0_i32 = arith.constant 0 : i32
    %c0_i32_0 = arith.constant 0 : i32
    %c0_i32_1 = arith.constant 0 : i32
    return %c0_i32, %c0_i32_0 : i32, i32
  }
  func.func @transform_8(%arg0: i32) -> (i32, i32) {
    %c0_i32 = arith.constant 0 : i32
    %c0_i32_0 = arith.constant 0 : i32
    %c0_i32_1 = arith.constant 0 : i32
    return %c0_i32, %c0_i32_0 : i32, i32
  }
  func.func @transform_9(%arg0: i32) -> (i32, i32) {
    %c0_i32 = arith.constant 0 : i32
    %c0_i32_0 = arith.constant 0 : i32
    %c0_i32_1 = arith.constant 0 : i32
    return %c0_i32, %c0_i32_0 : i32, i32
  }
  func.func @transform_10(%arg0: i32) -> (i32, i32) {
    %c0_i32 = arith.constant 0 : i32
    %c0_i32_0 = arith.constant 0 : i32
    %c0_i32_1 = arith.constant 0 : i32
    return %c0_i32, %c0_i32_0 : i32, i32
  }
  func.func @transform_11(%arg0: i32) -> (i32, i32) {
    %c0_i32 = arith.constant 0 : i32
    %c0_i32_0 = arith.constant 0 : i32
    %c0_i32_1 = arith.constant 0 : i32
    return %c0_i32, %c0_i32_0 : i32, i32
  }
  func.func @transform_12(%arg0: i32) -> (i32, i32) {
    %c0_i32 = arith.constant 0 : i32
    %c0_i32_0 = arith.constant 0 : i32
    %c0_i32_1 = arith.constant 0 : i32
    return %c0_i32, %c0_i32_0 : i32, i32
  }
  func.func @transform_13(%arg0: i32) -> (i32, i32) {
    %c0_i32 = arith.constant 0 : i32
    %c0_i32_0 = arith.constant 0 : i32
    %c0_i32_1 = arith.constant 0 : i32
    return %c0_i32, %c0_i32_0 : i32, i32
  }
  func.func @transform_14(%arg0: i32) -> (i32, i32) {
    %c0_i32 = arith.constant 0 : i32
    %c0_i32_0 = arith.constant 0 : i32
    return %arg0, %c0_i32 : i32, i32
  }
  func.func @transform_15(%arg0: i32) -> (i32, i32) {
    %c0_i32 = arith.constant 0 : i32
    %c0_i32_0 = arith.constant 0 : i32
    return %arg0, %c0_i32 : i32, i32
  }
}

module attributes {stable_mosaic.version = 11 : i64} {
  func.func @kernel(%arg0: i32, %arg1: memref<16x128xbf16, #tpu.memory_space<vmem>>, %arg2: memref<16x128xf32, #tpu.memory_space<vmem>>, %arg3: memref<128x128xbf16, #tpu.memory_space<vmem>>, %arg4: memref<1x128xf32, #tpu.memory_space<vmem>>, %arg5: memref<128x128xbf16, #tpu.memory_space<vmem>>, %arg6: memref<1x128xf32, #tpu.memory_space<vmem>>, %arg7: memref<128x256xbf16, #tpu.memory_space<vmem>>, %arg8: memref<1x256xf32, #tpu.memory_space<vmem>>, %arg9: memref<128x128xbf16, #tpu.memory_space<vmem>>, %arg10: memref<1x128xf32, #tpu.memory_space<vmem>>, %arg11: memref<128x128xbf16, #tpu.memory_space<vmem>>, %arg12: memref<1x128xf32, #tpu.memory_space<vmem>>, %arg13: memref<128x128xbf16, #tpu.memory_space<vmem>>, %arg14: memref<1x128xf32, #tpu.memory_space<vmem>>, %arg15: memref<16x128xf32, #tpu.memory_space<vmem>>, %arg16: memref<16x256xf32, #tpu.memory_space<vmem>>) attributes {dimension_semantics = [#tpu.dimension_semantics<parallel>], iteration_bounds = array<i64: 1>, scalar_prefetch = 0 : i64, scratch_operands = 0 : i64, tpu.core_type = #tpu.core_type<tc>, window_params = [{transform_indices = @transform_0, window_bounds = array<i64: 16, 128>}, {transform_indices = @transform_1, window_bounds = array<i64: 16, 128>}, {pipeline_mode = #tpu.pipeline_mode<synchronous>, transform_indices = @transform_2, window_bounds = array<i64: 128, 128>}, {pipeline_mode = #tpu.pipeline_mode<synchronous>, transform_indices = @transform_3, window_bounds = array<i64: 1, 128>}, {pipeline_mode = #tpu.pipeline_mode<synchronous>, transform_indices = @transform_4, window_bounds = array<i64: 128, 128>}, {pipeline_mode = #tpu.pipeline_mode<synchronous>, transform_indices = @transform_5, window_bounds = array<i64: 1, 128>}, {pipeline_mode = #tpu.pipeline_mode<synchronous>, transform_indices = @transform_6, window_bounds = array<i64: 128, 256>}, {pipeline_mode = #tpu.pipeline_mode<synchronous>, transform_indices = @transform_7, window_bounds = array<i64: 1, 256>}, {pipeline_mode = #tpu.pipeline_mode<synchronous>, transform_indices = @transform_8, window_bounds = array<i64: 128, 128>}, {pipeline_mode = #tpu.pipeline_mode<synchronous>, transform_indices = @transform_9, window_bounds = array<i64: 1, 128>}, {pipeline_mode = #tpu.pipeline_mode<synchronous>, transform_indices = @transform_10, window_bounds = array<i64: 128, 128>}, {pipeline_mode = #tpu.pipeline_mode<synchronous>, transform_indices = @transform_11, window_bounds = array<i64: 1, 128>}, {pipeline_mode = #tpu.pipeline_mode<synchronous>, transform_indices = @transform_12, window_bounds = array<i64: 128, 128>}, {pipeline_mode = #tpu.pipeline_mode<synchronous>, transform_indices = @transform_13, window_bounds = array<i64: 1, 128>}, {transform_indices = @transform_14, window_bounds = array<i64: 16, 128>}, {transform_indices = @transform_15, window_bounds = array<i64: 16, 256>}]} {
    %c0 = arith.constant 0 : index
    %c0_0 = arith.constant 0 : index
    %0 = vector.load %arg1[%c0, %c0_0] : memref<16x128xbf16, #tpu.memory_space<vmem>>, vector<16x128xbf16>
    %c0_1 = arith.constant 0 : index
    %c0_2 = arith.constant 0 : index
    %1 = vector.load %arg3[%c0_1, %c0_2] : memref<128x128xbf16, #tpu.memory_space<vmem>>, vector<128x128xbf16>
    %cst = arith.constant dense<0.000000e+00> : vector<16x128xf32>
    %2 = tpu.matmul %0, %1, %cst {dimension_numbers = #tpu.dot_dimension_numbers<[1], [0], [0], [1], [0, 0, 1, 1], [], []>} : vector<16x128xbf16>, vector<128x128xbf16>, vector<16x128xf32> -> vector<16x128xf32>
    %c0_3 = arith.constant 0 : index
    %c0_4 = arith.constant 0 : index
    %3 = vector.load %arg4[%c0_3, %c0_4] : memref<1x128xf32, #tpu.memory_space<vmem>>, vector<1x128xf32>
    %4 = vector.broadcast %3 : vector<1x128xf32> to vector<16x128xf32>
    %5 = arith.addf %2, %4 : vector<16x128xf32>
    %cst_5 = arith.constant 0.000000e+00 : f32
    %6 = vector.broadcast %cst_5 : f32 to vector<16x128xf32>
    %7 = arith.maximumf %5, %6 : vector<16x128xf32>
    %8 = arith.truncf %7 : vector<16x128xf32> to vector<16x128xbf16>
    %c0_6 = arith.constant 0 : index
    %c0_7 = arith.constant 0 : index
    %9 = vector.load %arg5[%c0_6, %c0_7] : memref<128x128xbf16, #tpu.memory_space<vmem>>, vector<128x128xbf16>
    %cst_8 = arith.constant dense<0.000000e+00> : vector<16x128xf32>
    %10 = tpu.matmul %8, %9, %cst_8 {dimension_numbers = #tpu.dot_dimension_numbers<[1], [0], [0], [1], [0, 0, 1, 1], [], []>} : vector<16x128xbf16>, vector<128x128xbf16>, vector<16x128xf32> -> vector<16x128xf32>
    %c0_9 = arith.constant 0 : index
    %c0_10 = arith.constant 0 : index
    %11 = vector.load %arg6[%c0_9, %c0_10] : memref<1x128xf32, #tpu.memory_space<vmem>>, vector<1x128xf32>
    %12 = vector.broadcast %11 : vector<1x128xf32> to vector<16x128xf32>
    %13 = arith.addf %10, %12 : vector<16x128xf32>
    %cst_11 = arith.constant 0.000000e+00 : f32
    %14 = vector.broadcast %cst_11 : f32 to vector<16x128xf32>
    %15 = arith.maximumf %13, %14 : vector<16x128xf32>
    %16 = arith.truncf %15 : vector<16x128xf32> to vector<16x128xbf16>
    %c0_12 = arith.constant 0 : index
    %c0_13 = arith.constant 0 : index
    %17 = vector.load %arg7[%c0_12, %c0_13] : memref<128x256xbf16, #tpu.memory_space<vmem>>, vector<128x256xbf16>
    %cst_14 = arith.constant dense<0.000000e+00> : vector<16x256xf32>
    %18 = tpu.matmul %16, %17, %cst_14 {dimension_numbers = #tpu.dot_dimension_numbers<[1], [0], [0], [1], [0, 0, 1, 1], [], []>} : vector<16x128xbf16>, vector<128x256xbf16>, vector<16x256xf32> -> vector<16x256xf32>
    %c0_15 = arith.constant 0 : index
    %c0_16 = arith.constant 0 : index
    %19 = vector.load %arg8[%c0_15, %c0_16] : memref<1x256xf32, #tpu.memory_space<vmem>>, vector<1x256xf32>
    %20 = vector.broadcast %19 : vector<1x256xf32> to vector<16x256xf32>
    %21 = arith.addf %18, %20 : vector<16x256xf32>
    %22 = vector.extract_strided_slice %21 {offsets = [0, 0], sizes = [16, 128], strides = [1, 1]} : vector<16x256xf32> to vector<16x128xf32>
    %23 = vector.extract_strided_slice %21 {offsets = [0, 128], sizes = [16, 128], strides = [1, 1]} : vector<16x256xf32> to vector<16x128xf32>
    %cst_17 = arith.constant 5.000000e-01 : f32
    %24 = vector.broadcast %cst_17 : f32 to vector<16x128xf32>
    %25 = arith.mulf %24, %23 : vector<16x128xf32>
    %26 = math.exp %25 : vector<16x128xf32>
    %c0_18 = arith.constant 0 : index
    %c0_19 = arith.constant 0 : index
    %27 = vector.load %arg2[%c0_18, %c0_19] : memref<16x128xf32, #tpu.memory_space<vmem>>, vector<16x128xf32>
    %28 = arith.mulf %26, %27 : vector<16x128xf32>
    %29 = arith.addf %22, %28 : vector<16x128xf32>
    %30 = arith.truncf %29 : vector<16x128xf32> to vector<16x128xbf16>
    %c0_20 = arith.constant 0 : index
    %c0_21 = arith.constant 0 : index
    %31 = vector.load %arg9[%c0_20, %c0_21] : memref<128x128xbf16, #tpu.memory_space<vmem>>, vector<128x128xbf16>
    %cst_22 = arith.constant dense<0.000000e+00> : vector<16x128xf32>
    %32 = tpu.matmul %30, %31, %cst_22 {dimension_numbers = #tpu.dot_dimension_numbers<[1], [0], [0], [1], [0, 0, 1, 1], [], []>} : vector<16x128xbf16>, vector<128x128xbf16>, vector<16x128xf32> -> vector<16x128xf32>
    %c0_23 = arith.constant 0 : index
    %c0_24 = arith.constant 0 : index
    %33 = vector.load %arg10[%c0_23, %c0_24] : memref<1x128xf32, #tpu.memory_space<vmem>>, vector<1x128xf32>
    %34 = vector.broadcast %33 : vector<1x128xf32> to vector<16x128xf32>
    %35 = arith.addf %32, %34 : vector<16x128xf32>
    %cst_25 = arith.constant 0.000000e+00 : f32
    %36 = vector.broadcast %cst_25 : f32 to vector<16x128xf32>
    %37 = arith.maximumf %35, %36 : vector<16x128xf32>
    %38 = arith.truncf %37 : vector<16x128xf32> to vector<16x128xbf16>
    %c0_26 = arith.constant 0 : index
    %c0_27 = arith.constant 0 : index
    %39 = vector.load %arg11[%c0_26, %c0_27] : memref<128x128xbf16, #tpu.memory_space<vmem>>, vector<128x128xbf16>
    %cst_28 = arith.constant dense<0.000000e+00> : vector<16x128xf32>
    %40 = tpu.matmul %38, %39, %cst_28 {dimension_numbers = #tpu.dot_dimension_numbers<[1], [0], [0], [1], [0, 0, 1, 1], [], []>} : vector<16x128xbf16>, vector<128x128xbf16>, vector<16x128xf32> -> vector<16x128xf32>
    %c0_29 = arith.constant 0 : index
    %c0_30 = arith.constant 0 : index
    %41 = vector.load %arg12[%c0_29, %c0_30] : memref<1x128xf32, #tpu.memory_space<vmem>>, vector<1x128xf32>
    %42 = vector.broadcast %41 : vector<1x128xf32> to vector<16x128xf32>
    %43 = arith.addf %40, %42 : vector<16x128xf32>
    %cst_31 = arith.constant 0.000000e+00 : f32
    %44 = vector.broadcast %cst_31 : f32 to vector<16x128xf32>
    %45 = arith.maximumf %43, %44 : vector<16x128xf32>
    %46 = arith.truncf %45 : vector<16x128xf32> to vector<16x128xbf16>
    %c0_32 = arith.constant 0 : index
    %c0_33 = arith.constant 0 : index
    %47 = vector.load %arg13[%c0_32, %c0_33] : memref<128x128xbf16, #tpu.memory_space<vmem>>, vector<128x128xbf16>
    %cst_34 = arith.constant dense<0.000000e+00> : vector<16x128xf32>
    %48 = tpu.matmul %46, %47, %cst_34 {dimension_numbers = #tpu.dot_dimension_numbers<[1], [0], [0], [1], [0, 0, 1, 1], [], []>} : vector<16x128xbf16>, vector<128x128xbf16>, vector<16x128xf32> -> vector<16x128xf32>
    %c0_35 = arith.constant 0 : index
    %c0_36 = arith.constant 0 : index
    %49 = vector.load %arg14[%c0_35, %c0_36] : memref<1x128xf32, #tpu.memory_space<vmem>>, vector<1x128xf32>
    %50 = vector.broadcast %49 : vector<1x128xf32> to vector<16x128xf32>
    %51 = arith.addf %48, %50 : vector<16x128xf32>
    %c0_37 = arith.constant 0 : index
    %c0_38 = arith.constant 0 : index
    %52 = vector.load %arg15[%c0_37, %c0_38] : memref<16x128xf32, #tpu.memory_space<vmem>>, vector<16x128xf32>
    tpu.vector_store %arg15[%c0_37, %c0_38], %51 {strides = array<i32>} : memref<16x128xf32, #tpu.memory_space<vmem>>, vector<16x128xf32>,
    %c0_39 = arith.constant 0 : index
    %c0_40 = arith.constant 0 : index
    %53 = vector.load %arg16[%c0_39, %c0_40] : memref<16x256xf32, #tpu.memory_space<vmem>>, vector<16x256xf32>
    tpu.vector_store %arg16[%c0_39, %c0_40], %21 {strides = array<i32>} : memref<16x256xf32, #tpu.memory_space<vmem>>, vector<16x256xf32>,
    return
  }
  func.func @transform_0(%arg0: i32) -> (i32, i32) {
    %c0_i32 = arith.constant 0 : i32
    %c0_i32_0 = arith.constant 0 : i32
    return %arg0, %c0_i32 : i32, i32
  }
  func.func @transform_1(%arg0: i32) -> (i32, i32) {
    %c0_i32 = arith.constant 0 : i32
    %c0_i32_0 = arith.constant 0 : i32
    return %arg0, %c0_i32 : i32, i32
  }
  func.func @transform_2(%arg0: i32) -> (i32, i32) {
    %c0_i32 = arith.constant 0 : i32
    %c0_i32_0 = arith.constant 0 : i32
    %c0_i32_1 = arith.constant 0 : i32
    return %c0_i32, %c0_i32_0 : i32, i32
  }
  func.func @transform_3(%arg0: i32) -> (i32, i32) {
    %c0_i32 = arith.constant 0 : i32
    %c0_i32_0 = arith.constant 0 : i32
    %c0_i32_1 = arith.constant 0 : i32
    return %c0_i32, %c0_i32_0 : i32, i32
  }
  func.func @transform_4(%arg0: i32) -> (i32, i32) {
    %c0_i32 = arith.constant 0 : i32
    %c0_i32_0 = arith.constant 0 : i32
    %c0_i32_1 = arith.constant 0 : i32
    return %c0_i32, %c0_i32_0 : i32, i32
  }
  func.func @transform_5(%arg0: i32) -> (i32, i32) {
    %c0_i32 = arith.constant 0 : i32
    %c0_i32_0 = arith.constant 0 : i32
    %c0_i32_1 = arith.constant 0 : i32
    return %c0_i32, %c0_i32_0 : i32, i32
  }
  func.func @transform_6(%arg0: i32) -> (i32, i32) {
    %c0_i32 = arith.constant 0 : i32
    %c0_i32_0 = arith.constant 0 : i32
    %c0_i32_1 = arith.constant 0 : i32
    return %c0_i32, %c0_i32_0 : i32, i32
  }
  func.func @transform_7(%arg0: i32) -> (i32, i32) {
    %c0_i32 = arith.constant 0 : i32
    %c0_i32_0 = arith.constant 0 : i32
    %c0_i32_1 = arith.constant 0 : i32
    return %c0_i32, %c0_i32_0 : i32, i32
  }
  func.func @transform_8(%arg0: i32) -> (i32, i32) {
    %c0_i32 = arith.constant 0 : i32
    %c0_i32_0 = arith.constant 0 : i32
    %c0_i32_1 = arith.constant 0 : i32
    return %c0_i32, %c0_i32_0 : i32, i32
  }
  func.func @transform_9(%arg0: i32) -> (i32, i32) {
    %c0_i32 = arith.constant 0 : i32
    %c0_i32_0 = arith.constant 0 : i32
    %c0_i32_1 = arith.constant 0 : i32
    return %c0_i32, %c0_i32_0 : i32, i32
  }
  func.func @transform_10(%arg0: i32) -> (i32, i32) {
    %c0_i32 = arith.constant 0 : i32
    %c0_i32_0 = arith.constant 0 : i32
    %c0_i32_1 = arith.constant 0 : i32
    return %c0_i32, %c0_i32_0 : i32, i32
  }
  func.func @transform_11(%arg0: i32) -> (i32, i32) {
    %c0_i32 = arith.constant 0 : i32
    %c0_i32_0 = arith.constant 0 : i32
    %c0_i32_1 = arith.constant 0 : i32
    return %c0_i32, %c0_i32_0 : i32, i32
  }
  func.func @transform_12(%arg0: i32) -> (i32, i32) {
    %c0_i32 = arith.constant 0 : i32
    %c0_i32_0 = arith.constant 0 : i32
    %c0_i32_1 = arith.constant 0 : i32
    return %c0_i32, %c0_i32_0 : i32, i32
  }
  func.func @transform_13(%arg0: i32) -> (i32, i32) {
    %c0_i32 = arith.constant 0 : i32
    %c0_i32_0 = arith.constant 0 : i32
    %c0_i32_1 = arith.constant 0 : i32
    return %c0_i32, %c0_i32_0 : i32, i32
  }
  func.func @transform_14(%arg0: i32) -> (i32, i32) {
    %c0_i32 = arith.constant 0 : i32
    %c0_i32_0 = arith.constant 0 : i32
    return %arg0, %c0_i32 : i32, i32
  }
  func.func @transform_15(%arg0: i32) -> (i32, i32) {
    %c0_i32 = arith.constant 0 : i32
    %c0_i32_0 = arith.constant 0 : i32
    return %arg0, %c0_i32 : i32, i32
  }
}

</mosaic_0001>

<bundles_post_ra>
// kernel: tpu_custom_call.1
= control target key start
LH: loop header
LB: loop body
LE: loop exit
PB: predicated region body
PF: predicated region fallthrough
CT: control target
= control target key end

     0   :  { %s1791_s0 = inlined_call_operand.hbm [shape: bf16[16,128], index: 0, kind: input, shape index: {}]   ;;  %s1792_s1 = inlined_call_operand.hbm [shape: f32[16,128], index: 1, kind: input, shape index: {}]   ;;  %s1793_s2 = inlined_call_operand.hbm [shape: bf16[128,128], index: 2, kind: input, shape index: {}]   ;;  %s1794_s3 = inlined_call_operand.vmem [shape: f32[1,128], index: 3, kind: input, shape index: {}]   ;;  %s1795_s4 = inlined_call_operand.hbm [shape: bf16[128,128], index: 4, kind: input, shape index: {}]   ;;  %s1796_s5 = inlined_call_operand.vmem [shape: f32[1,128], index: 5, kind: input, shape index: {}]   ;;  %s1797_s6 = inlined_call_operand.hbm [shape: bf16[128,256], index: 6, kind: input, shape index: {}]   ;;  %s1798_s7 = inlined_call_operand.vmem [shape: f32[1,256], index: 7, kind: input, shape index: {}]   ;;  %s1799_s8 = inlined_call_operand.hbm [shape: bf16[128,128], index: 8, kind: input, shape index: {}]   ;;  %s1800_s9 = inlined_call_operand.vmem [shape: f32[1,128], index: 9, kind: input, shape index: {}]   ;;  %s1801_s10 = inlined_call_operand.hbm [shape: bf16[128,128], index: 10, kind: input, shape index: {}]   ;;  %s1802_s11 = inlined_call_operand.vmem [shape: f32[1,128], index: 11, kind: input, shape index: {}]   ;;  %s1803_s12 = inlined_call_operand.hbm [shape: bf16[128,128], index: 12, kind: input, shape index: {}]   ;;  %s1804_s13 = inlined_call_operand.vmem [shape: f32[1,128], index: 13, kind: input, shape index: {}]   ;;  %s1805_s14 = inlined_call_operand.hbm [shape: f32[16,128], index: 14, kind: output, shape index: {0}]   ;;  %s1806_s15 = inlined_call_operand.hbm [shape: f32[16,256], index: 15, kind: output, shape index: {1}]  }
   0x1   :  { %1808 = sst [smem:[#allocation26_spill]] %s1805_s14 }
   0x2   :  { %21 = vsyncpa [#allocation3], 0 }
   0x3   :  { %22 = vsyncpa [#allocation6], 0 }
   0x4   :  { %23 = vsyncpa [#allocation9], 0 }
   0x5   :  { %24 = vsyncpa [#allocation12], 0 }
   0x6   :  { %25 = vsyncpa [#allocation15], 0 }
   0x7   :  { %26 = vsyncpa [#allocation4], 0 }
   0x8   :  { %27 = vsyncpa [#allocation18], 0  ;;  %s1477_s18 = smov [#allocation5]   ;;  %s1243_s22 = scalar_lea.hbm %s1792_s1, 256 }
   0x9   :  { %s45_s19 = sshll.u32 %s1477_s18, 4  ;;  %p1244_p0 = scmp.ne.s32.totalorder %s1792_s1, %s1243_s22  ;;  %s46_s19 = int_to_ptr.vmem [resolvable:$true] %s45_s19 }
   0xa   :  { %p1247_p1 = scmp.lt.u32.totalorder %s1243_s22, %s1792_s1 }
   0xc   :  { %p1249_p2 = pnand %p1247_p1, %p1244_p0 }
   0xe   :  { %1252 = shalt.err (!%p1249_p2)
}
   0xf   :  { %s1253_s27 = scalar_lea.vmem %s46_s19, 256  ;;  %p1258_p4 = scmp.lt.s32.totalorder %s46_s19, %s46_s19 }
  0x10   :  { %p1254_p3 = scmp.ne.s32.totalorder %s46_s19, %s1253_s27  ;;  %p1259_p5 = scmp.lt.s32.totalorder %s1253_s27, %s1253_s27 }
  0x12   :  { %p1260_p6 = por %p1259_p5, %p1258_p4 }
  0x14   :  { %p1261_p7 = pnand %p1260_p6, %p1254_p3 }
  0x16   :  { %1264 = shalt.err (!%p1261_p7)
}
  0x17   :  { %s1478_s28 = smov 128   ;;  %s1479_s29 = smov 8  }
  0x18   :  { %51 = dma.hbm_to_vmem [thread:$0]  %s1792_s1, 256, %s46_s19, [#allocation6], %s1478_s28, %s1478_s28, %s1479_s29  }
  0x19   :  { %s1480_s17 = smov [#allocation8]   ;;  %s1481_s20 = smov [#allocation11]  }
  0x1a   :  { %s71_s18 = sshll.u32 %s1480_s17, 4  ;;  %s99_s21 = sshll.u32 %s1481_s20, 4  ;;  %s72_s18 = int_to_ptr.vmem [resolvable:$true] %s71_s18  ;;  %s100_s21 = int_to_ptr.vmem [resolvable:$true] %s99_s21 }
  0x1b   :  { %s1265_s24 = scalar_lea.hbm %s1795_s4, 1024 }
  0x1c   :  { %p1266_p8 = scmp.ne.s32.totalorder %s1795_s4, %s1265_s24  ;;  %p1269_p9 = scmp.lt.u32.totalorder %s1265_s24, %s1795_s4 }
  0x1e   :  { %p1271_p10 = pnand %p1269_p9, %p1266_p8 }
  0x20   :  { %1274 = shalt.err (!%p1271_p10)
}
  0x21   :  { %s1275_s1 = scalar_lea.vmem %s72_s18, 1024  ;;  %p1280_p12 = scmp.lt.s32.totalorder %s72_s18, %s72_s18 }
  0x22   :  { %p1276_p11 = scmp.ne.s32.totalorder %s72_s18, %s1275_s1  ;;  %p1281_p13 = scmp.lt.s32.totalorder %s1275_s1, %s1275_s1 }
  0x24   :  { %p1282_p0 = por %p1281_p13, %p1280_p12 }
  0x26   :  { %p1283_p1 = pnand %p1282_p0, %p1276_p11 }
  0x28   :  { %1286 = shalt.err (!%p1283_p1)
}
  0x29   :  { %s1482_s19 = smov 64   ;;  %s1483_s30 = smov 4  }
  0x2a   :  { %77 = dma.hbm_to_vmem [thread:$0]  %s1795_s4, 1024, %s72_s18, [#allocation9], %s1482_s19, %s1482_s19, %s1483_s30  }
  0x2b   :  { %s1287_s22 = scalar_lea.hbm %s1799_s8, 1024 }
  0x2c   :  { %p1288_p2 = scmp.ne.s32.totalorder %s1799_s8, %s1287_s22  ;;  %p1291_p3 = scmp.lt.u32.totalorder %s1287_s22, %s1799_s8 }
  0x2e   :  { %p1293_p4 = pnand %p1291_p3, %p1288_p2 }
  0x30   :  { %1296 = shalt.err (!%p1293_p4)
}
  0x31   :  { %s1297_s27 = scalar_lea.vmem %s100_s21, 1024  ;;  %p1302_p6 = scmp.lt.s32.totalorder %s100_s21, %s100_s21 }
  0x32   :  { %p1298_p5 = scmp.ne.s32.totalorder %s100_s21, %s1297_s27  ;;  %p1303_p7 = scmp.lt.s32.totalorder %s1297_s27, %s1297_s27 }
  0x34   :  { %p1304_p8 = por %p1303_p7, %p1302_p6 }
  0x36   :  { %p1305_p9 = pnand %p1304_p8, %p1298_p5 }
  0x38   :  { %1308 = shalt.err (!%p1305_p9)
}
  0x39   :  { %105 = dma.hbm_to_vmem [thread:$0]  %s1799_s8, 1024, %s100_s21, [#allocation12], %s1482_s19, %s1482_s19, %s1483_s30  }
  0x3a   :  { %s1484_s1 = smov [#allocation2]   ;;  %s1485_s17 = smov [#allocation7]  }
  0x3b   :  { %s33_s16 = sshll.u32 %s1484_s1, 4  ;;  %s57_s14 = sshll.u32 %s1485_s17, 4  ;;  %s34_s16 = int_to_ptr.vmem [resolvable:$true] %s33_s16  ;;  %s58_s14 = int_to_ptr.vmem [resolvable:$true] %s57_s14 }
  0x3c   :  { %s1309_s23 = scalar_lea.hbm %s1791_s0, 128 }
  0x3d   :  { %p1310_p10 = scmp.ne.s32.totalorder %s1791_s0, %s1309_s23  ;;  %p1313_p11 = scmp.lt.u32.totalorder %s1309_s23, %s1791_s0 }
  0x3f   :  { %p1315_p12 = pnand %p1313_p11, %p1310_p10 }
  0x41   :  { %1318 = shalt.err (!%p1315_p12)
}
  0x42   :  { %s1319_s8 = scalar_lea.vmem %s34_s16, 128  ;;  %p1324_p0 = scmp.lt.s32.totalorder %s34_s16, %s34_s16 }
  0x43   :  { %p1320_p13 = scmp.ne.s32.totalorder %s34_s16, %s1319_s8  ;;  %p1325_p1 = scmp.lt.s32.totalorder %s1319_s8, %s1319_s8 }
  0x45   :  { %p1326_p2 = por %p1325_p1, %p1324_p0 }
  0x47   :  { %p1327_p3 = pnand %p1326_p2, %p1320_p13 }
  0x49   :  { %1330 = shalt.err (!%p1327_p3)
}
  0x4a   :  { %39 = dma.hbm_to_vmem [thread:$0]  %s1791_s0, 128, %s34_s16, [#allocation3], %s1482_s19, %s1482_s19, %s1483_s30  }
  0x4b   :  { %s1331_s17 = scalar_lea.hbm %s1793_s2, 1024 }
  0x4c   :  { %p1332_p4 = scmp.ne.s32.totalorder %s1793_s2, %s1331_s17  ;;  %p1335_p5 = scmp.lt.u32.totalorder %s1331_s17, %s1793_s2 }
  0x4e   :  { %p1337_p6 = pnand %p1335_p5, %p1332_p4 }
  0x50   :  { %1340 = shalt.err (!%p1337_p6)
}
  0x51   :  { %s1341_s25 = scalar_lea.vmem %s58_s14, 1024  ;;  %p1346_p8 = scmp.lt.s32.totalorder %s58_s14, %s58_s14 }
  0x52   :  { %p1342_p7 = scmp.ne.s32.totalorder %s58_s14, %s1341_s25  ;;  %p1347_p9 = scmp.lt.s32.totalorder %s1341_s25, %s1341_s25 }
  0x54   :  { %p1348_p10 = por %p1347_p9, %p1346_p8 }
  0x56   :  { %p1349_p11 = pnand %p1348_p10, %p1342_p7 }
  0x58   :  { %1352 = shalt.err (!%p1349_p11)
}
  0x59   :  { %63 = dma.hbm_to_vmem [thread:$0]  %s1793_s2, 1024, %s58_s14, [#allocation6], %s1482_s19, %s1482_s19, %s1483_s30  }
  0x5a   :  { %s1486_s26 = smov [#allocation10]   ;;  %s1487_s8 = smov [#allocation13]  }
  0x5b   :  { %s85_s27 = sshll.u32 %s1486_s26, 4  ;;  %s113_s21 = sshll.u32 %s1487_s8, 4  ;;  %s86_s27 = int_to_ptr.vmem [resolvable:$true] %s85_s27  ;;  %s114_s21 = int_to_ptr.vmem [resolvable:$true] %s113_s21 }
  0x5c   :  { %s1353_s1 = scalar_lea.hbm %s1797_s6, 2048 }
  0x5d   :  { %p1354_p12 = scmp.ne.s32.totalorder %s1797_s6, %s1353_s1  ;;  %p1357_p13 = scmp.lt.u32.totalorder %s1353_s1, %s1797_s6 }
  0x5f   :  { %p1359_p0 = pnand %p1357_p13, %p1354_p12 }
  0x61   :  { %1362 = shalt.err (!%p1359_p0)
}
  0x62   :  { %s1363_s2 = scalar_lea.vmem %s86_s27, 2048  ;;  %p1368_p2 = scmp.lt.s32.totalorder %s86_s27, %s86_s27 }
  0x63   :  { %p1364_p1 = scmp.ne.s32.totalorder %s86_s27, %s1363_s2  ;;  %p1369_p3 = scmp.lt.s32.totalorder %s1363_s2, %s1363_s2 }
  0x65   :  { %p1370_p4 = por %p1369_p3, %p1368_p2 }
  0x67   :  { %p1371_p5 = pnand %p1370_p4, %p1364_p1 }
  0x69   :  { %1374 = shalt.err (!%p1371_p5)
}
  0x6a   :  { %91 = dma.hbm_to_vmem [thread:$0]  %s1797_s6, 2048, %s86_s27, [#allocation9], %s1478_s28, %s1478_s28, %s1479_s29  }
  0x6b   :  { %s1375_s16 = scalar_lea.hbm %s1801_s10, 1024 }
  0x6c   :  { %p1376_p6 = scmp.ne.s32.totalorder %s1801_s10, %s1375_s16  ;;  %p1379_p7 = scmp.lt.u32.totalorder %s1375_s16, %s1801_s10 }
  0x6e   :  { %p1381_p8 = pnand %p1379_p7, %p1376_p6 }
  0x70   :  { %1384 = shalt.err (!%p1381_p8)
}
  0x71   :  { %s1385_s1 = scalar_lea.vmem %s114_s21, 1024  ;;  %p1390_p10 = scmp.lt.s32.totalorder %s114_s21, %s114_s21 }
  0x72   :  { %p1386_p9 = scmp.ne.s32.totalorder %s114_s21, %s1385_s1  ;;  %p1391_p11 = scmp.lt.s32.totalorder %s1385_s1, %s1385_s1 }
  0x74   :  { %p1392_p12 = por %p1391_p11, %p1390_p10 }
  0x76   :  { %p1393_p13 = pnand %p1392_p12, %p1386_p9 }
  0x78   :  { %1396 = shalt.err (!%p1393_p13)
}
  0x79   :  { %119 = dma.hbm_to_vmem [thread:$0]  %s1801_s10, 1024, %s114_s21, [#allocation12], %s1482_s19, %s1482_s19, %s1483_s30  }
  0x7a   :  { %s1488_s17 = smov [#allocation14]   ;;  %s1397_s2 = scalar_lea.hbm %s1803_s12, 1024 }
  0x7b   :  { %s127_s20 = sshll.u32 %s1488_s17, 4  ;;  %p1398_p0 = scmp.ne.s32.totalorder %s1803_s12, %s1397_s2  ;;  %s128_s20 = int_to_ptr.vmem [resolvable:$true] %s127_s20 }
  0x7c   :  { %p1401_p1 = scmp.lt.u32.totalorder %s1397_s2, %s1803_s12 }
  0x7e   :  { %p1403_p2 = pnand %p1401_p1, %p1398_p0 }
  0x80   :  { %1406 = shalt.err (!%p1403_p2)
}
  0x81   :  { %s1407_s16 = scalar_lea.vmem %s128_s20, 1024  ;;  %p1412_p4 = scmp.lt.s32.totalorder %s128_s20, %s128_s20 }
  0x82   :  { %p1408_p3 = scmp.ne.s32.totalorder %s128_s20, %s1407_s16  ;;  %p1413_p5 = scmp.lt.s32.totalorder %s1407_s16, %s1407_s16 }
  0x84   :  { %p1414_p6 = por %p1413_p5, %p1412_p4 }
  0x86   :  { %p1415_p7 = pnand %p1414_p6, %p1408_p3 }
  0x88   :  { %1418 = shalt.err (!%p1415_p7)
}
  0x89   :  { %133 = dma.hbm_to_vmem [thread:$0]  %s1803_s12, 1024, %s128_s20, [#allocation15], %s1482_s19, %s1482_s19, %s1483_s30  }
  0x8a   :  { %1463 = dma.done.wait [#allocation3], 128  }
  0x8b   :  { %1464 = vsyncadd [#allocation3], 4294967168 }
  0x8c   :  { %1465 = dma.done.wait [#allocation6], 1280  }
  0x8d   :  { %1466 = vsyncadd [#allocation6], 4294966016 }
  0x8e   :  { %1467 = dma.done.wait [#allocation9], 3072  }
  0x8f   :  { %1468 = vsyncadd [#allocation9], 4294964224 }
  0x90   :  { %1469 = dma.done.wait [#allocation12], 2048  }
  0x91   :  { %1470 = vsyncadd [#allocation12], 4294965248 }
  0x92   :  { %1471 = dma.done.wait [#allocation15], 1024  }
  0x93   :  { %1472 = vsyncadd [#allocation15], 4294966272  ;;  %v1489_v0 = vmov 0.0   ;;  %vm1490_vm0 = vmmov 0   ;;  %v1174_v1 = vld [vmem:[#allocation7] sm:$0xff]   ;;  %v1175_v2 = vld [vmem:[#allocation7 + $0x8] sm:$0xff]  }
  0x94   :  { %1055 = vmatprep.subr.bf16.mxu0 %v1489_v0  ;;  %1071 = vmatprep.mubr.msk.bf16.mxu0 %vm1490_vm0, %v1489_v0  ;;  %v1176_v3 = vld [vmem:[#allocation7 + $0x10] sm:$0xff]   ;;  %v1183_v4 = vld [vmem:[#allocation8] sm:$0xff]   ;;  %v1177_v5 = vld [vmem:[#allocation7 + $0x18] sm:$0xff]   ;;  %v1491_v44 = vmov 0  }
  0x95   :  { %1075 = vmatprep.subr.bf16.mxu1 %v1489_v0  ;;  %1091 = vmatprep.mubr.msk.bf16.mxu1 %vm1490_vm0, %v1489_v0  ;;  %v1184_v6 = vld [vmem:[#allocation8 + $0x8] sm:$0xff]   ;;  %v1178_v7 = vld [vmem:[#allocation7 + $0x20] sm:$0xff]   ;;  %v1185_v8 = vld [vmem:[#allocation8 + $0x10] sm:$0xff]  }
  0x96   :  { %1056 = vmatpush3.bf16.msra.mxu0 %v1174_v1  ;;  %1076 = vmatpush3.bf16.msra.mxu1 %v1183_v4  ;;  %v1179_v9 = vld [vmem:[#allocation7 + $0x28] sm:$0xff]   ;;  %v1186_v10 = vld [vmem:[#allocation8 + $0x18] sm:$0xff]   ;;  %v1180_v11 = vld [vmem:[#allocation7 + $0x30] sm:$0xff]  }
  0x97   :  { %1057 = vmatprep.subr.bf16.mxu0 %v1489_v0  ;;  %1077 = vmatprep.subr.bf16.mxu1 %v1489_v0  ;;  %v1187_v12 = vld [vmem:[#allocation8 + $0x20] sm:$0xff]   ;;  %v1181_v13 = vld [vmem:[#allocation7 + $0x38] sm:$0xff]   ;;  %v1188_v14 = vld [vmem:[#allocation8 + $0x28] sm:$0xff]  }
  0x98   :  { %v1182_v15 = vld [vmem:[#allocation2] sm:$0xff]   ;;  %v1189_v16 = vld [vmem:[#allocation8 + $0x30] sm:$0xff]   ;;  %v1190_v17 = vld [vmem:[#allocation8 + $0x38] sm:$0xff]  }
  0x99   :  { %v1191_v18 = vld [vmem:[#allocation10] ss:$8 sps:$4 sm:$0xff]   ;;  %v1193_v19 = vld [vmem:[#allocation10 + $0x4] ss:$8 sps:$4 sm:$0xff]   ;;  %v1196_v20 = vld [vmem:[#allocation10 + $0x14] ss:$8 sps:$4 sm:$0xff]  }
  0x9a   :  { %1058 = vmatpush3.bf16.msra.mxu0 %v1175_v2  ;;  %1078 = vmatpush3.bf16.msra.mxu1 %v1184_v6  ;;  %v1194_v21 = vld [vmem:[#allocation10 + $0x10] ss:$8 sps:$4 sm:$0xff]   ;;  %v1199_v22 = vld [vmem:[#allocation10 + $0x24] ss:$8 sps:$4 sm:$0xff]   ;;  %v1197_v23 = vld [vmem:[#allocation10 + $0x20] ss:$8 sps:$4 sm:$0xff]   ;;  %v417_v6 = vlaneseq }
  0x9b   :  { %1059 = vmatprep.subr.bf16.mxu0 %v1489_v0  ;;  %1079 = vmatprep.subr.bf16.mxu1 %v1489_v0  ;;  %v1202_v24 = vld [vmem:[#allocation10 + $0x34] ss:$8 sps:$4 sm:$0xff]   ;;  %v1200_v25 = vld [vmem:[#allocation10 + $0x30] ss:$8 sps:$4 sm:$0xff]   ;;  %v1205_v26 = vld [vmem:[#allocation10 + $0x44] ss:$8 sps:$4 sm:$0xff]  }
  0x9c   :  { %v1203_v27 = vld [vmem:[#allocation10 + $0x40] ss:$8 sps:$4 sm:$0xff]   ;;  %v1208_v28 = vld [vmem:[#allocation10 + $0x54] ss:$8 sps:$4 sm:$0xff]   ;;  %v1206_v29 = vld [vmem:[#allocation10 + $0x50] ss:$8 sps:$4 sm:$0xff]  }
  0x9d   :  { %v948_v30 = vld [vmem:[%s1794_s3] ss:$0 sm:$0xff]  ;;  %v1211_v40 = vld [vmem:[#allocation10 + $0x64] ss:$8 sps:$4 sm:$0xff]   ;;  %v1214_v42 = vld [vmem:[#allocation10 + $0x74] ss:$8 sps:$4 sm:$0xff]  }
  0x9e   :  { %1060 = vmatpush3.bf16.msra.mxu0 %v1176_v3  ;;  %1080 = vmatpush3.bf16.msra.mxu1 %v1185_v8  ;;  %v1209_v41 = vld [vmem:[#allocation10 + $0x60] ss:$8 sps:$4 sm:$0xff]   ;;  %v1212_v43 = vld [vmem:[#allocation10 + $0x70] ss:$8 sps:$4 sm:$0xff]  }
  0x9f   :  { %1061 = vmatprep.subr.bf16.mxu0 %v1489_v0  ;;  %1081 = vmatprep.subr.bf16.mxu1 %v1489_v0  ;;  %v1215_v45 = vld [vmem:[#allocation11] sm:$0xff]   ;;  %v958_v46 = vld [vmem:[%s1796_s5] ss:$0 sm:$0xff]  ;;  %v1217_v57 = vld [vmem:[#allocation11 + $0x10] sm:$0xff]  }
  0xa0   :  { %v1216_v56 = vld [vmem:[#allocation11 + $0x8] sm:$0xff]   ;;  %v1218_v58 = vld [vmem:[#allocation11 + $0x18] sm:$0xff]   ;;  %v1219_v59 = vld [vmem:[#allocation11 + $0x20] sm:$0xff]  }
  0xa1   :  { %v1220_v60 = vld [vmem:[#allocation11 + $0x28] sm:$0xff]   ;;  %v1221_v61 = vld [vmem:[#allocation11 + $0x30] sm:$0xff]   ;;  %v1222_v62 = vld [vmem:[#allocation11 + $0x38] sm:$0xff]  }
  0xa2   :  { %1062 = vmatpush3.bf16.msra.mxu0 %v1177_v5  ;;  %1082 = vmatpush3.bf16.msra.mxu1 %v1186_v10  ;;  %v1223_v63 = vld [vmem:[#allocation13] sm:$0xff]   ;;  %v1224_v1 = vld [vmem:[#allocation13 + $0x8] sm:$0xff]   ;;  %v1225_v2 = vld [vmem:[#allocation13 + $0x10] sm:$0xff]  }
  0xa3   :  { %1063 = vmatprep.subr.bf16.mxu0 %v1489_v0  ;;  %1083 = vmatprep.subr.bf16.mxu1 %v1489_v0  ;;  %v1226_v3 = vld [vmem:[#allocation13 + $0x18] sm:$0xff]   ;;  %v1227_v4 = vld [vmem:[#allocation13 + $0x20] sm:$0xff]   ;;  %v1228_v5 = vld [vmem:[#allocation13 + $0x28] sm:$0xff]  }
  0xa6   :  { %1064 = vmatpush3.bf16.msra.mxu0 %v1178_v7  ;;  %1084 = vmatpush3.bf16.msra.mxu1 %v1187_v12  ;;  %v418_v7 = vshrl.u32 %v417_v6, 7 }
  0xa7   :  { %1065 = vmatprep.subr.bf16.mxu0 %v1489_v0  ;;  %1085 = vmatprep.subr.bf16.mxu1 %v1489_v0 }
  0xa8   :  { %v419_v8 = vsub.s32 0, %v418_v7  ;;  %v423_v10 = vsub.s32 1, %v418_v7 }
  0xaa   :  { %1066 = vmatpush3.bf16.msra.mxu0 %v1179_v9  ;;  %1086 = vmatpush3.bf16.msra.mxu1 %v1188_v14  ;;  %v415_v9 = vld [vmem:[%s1798_s7] sm:$0x3] }
  0xab   :  { %1067 = vmatprep.subr.bf16.mxu0 %v1489_v0  ;;  %1087 = vmatprep.subr.bf16.mxu1 %v1489_v0  ;;  %v424_v12 = vrot.slane %v415_v9, %v423_v10 }
  0xae   :  { %1068 = vmatpush3.bf16.msra.mxu0 %v1180_v11  ;;  %1088 = vmatpush3.bf16.msra.mxu1 %v1189_v16  ;;  %v420_v11 = vrot.slane %v415_v9, %v419_v8 }
  0xaf   :  { %1069 = vmatprep.subr.bf16.mxu0 %v1489_v0  ;;  %1089 = vmatprep.subr.bf16.mxu1 %v1489_v0 }
  0xb2   :  { %1070 = vmatpush3.bf16.msra.mxu0 %v1181_v13  ;;  %1090 = vmatpush3.bf16.msra.mxu1 %v1190_v17 }
  0xb3   :  { %1095 = vmatprep.subr.bf16.mxu1 %v1489_v0  ;;  %507 = vmatprep.subr.bf16.mxu0 %v1193_v19 }
  0xb5   :  { %1072 = vmatmul.mubr.bf16.vlgmr.msra.gmra.mrb[0].mxu0 %v1182_v15 }
  0xb6   :  { %508 = vmatpush1.bf16.msra.mxu0 %v1191_v18  ;;  %539 = vmatprep.mubr.bf16.mxu0 %v1491_v44 }
  0xb7   :  { %509 = vmatprep.subr.bf16.mxu0 %v1196_v20 }
  0xba   :  { %510 = vmatpush1.bf16.msra.mxu0 %v1194_v21 }
  0xbb   :  { %511 = vmatprep.subr.bf16.mxu0 %v1199_v22 }
  0xbe   :  { %512 = vmatpush1.bf16.msra.mxu0 %v1197_v23 }
  0xbf   :  { %513 = vmatprep.subr.bf16.mxu0 %v1202_v24 }
  0xc2   :  { %514 = vmatpush1.bf16.msra.mxu0 %v1200_v25  ;;  %v556_v25 = vld [vmem:[#allocation5] sm:$0xff] }
  0xc3   :  { %515 = vmatprep.subr.bf16.mxu0 %v1205_v26 }
  0xc6   :  { %516 = vmatpush1.bf16.msra.mxu0 %v1203_v27  ;;  %v557_v27 = vld [vmem:[#allocation5 + $0x8] sm:$0xff] }
  0xc7   :  { %517 = vmatprep.subr.bf16.mxu0 %v1208_v28 }
  0xca   :  { %518 = vmatpush1.bf16.msra.mxu0 %v1206_v29 }
  0xcb   :  { %519 = vmatprep.subr.bf16.mxu0 %v1211_v40  ;;  %v1235_v40 = vld [vmem:[#allocation14 + $0x20] sm:$0xff]  }
  0xce   :  { %520 = vmatpush1.bf16.msra.mxu0 %v1209_v41  ;;  %v1236_v41 = vld [vmem:[#allocation14 + $0x28] sm:$0xff]  }
  0xcf   :  { %521 = vmatprep.subr.bf16.mxu0 %v1214_v42  ;;  %v983_v42 = vld [vmem:[%s1800_s9] ss:$0 sm:$0xff]  ;;  %s1492_s9 = smov [#allocation17]  }
  0xd0   :  { %s928_s1 = sshll.u32 %s1492_s9, 4  ;;  %s929_s1 = int_to_ptr.vmem [resolvable:$true] %s928_s1 }
  0xd1   :  { %s1419_s6 = scalar_lea.vmem %s929_s1, 512  ;;  %p1424_p9 = scmp.lt.s32.totalorder %s929_s1, %s929_s1 }
  0xd2   :  { %522 = vmatpush1.bf16.msra.mxu0 %v1212_v43  ;;  %p1420_p8 = scmp.ne.s32.totalorder %s929_s1, %s1419_s6  ;;  %p1425_p10 = scmp.lt.s32.totalorder %s1419_s6, %s1419_s6 }
  0xd3   :  { %1115 = vmatprep.subr.bf16.mxu0 %v1489_v0 }
  0xd4   :  { %p1426_p11 = por %p1425_p10, %p1424_p9 }
  0xd6   :  { %p1427_p12 = pnand %p1426_p11, %p1420_p8 }
 0x188   :  { %v274_v31 = vpop.f32.mrb[0].mxu0 }
 0x189   :  { %v275_v32 = vadd.f32 %v948_v30, %v274_v31  ;;  %v1073_v33 = vpop.f32.mrb[1].mxu0 }
 0x18a   :  { %v277_v34 = vpop.f32.mrb[2].mxu0 }
 0x18b   :  { %v278_v35 = vadd.f32 %v948_v30, %v277_v34  ;;  %v1074_v36 = vpop.f32.mrb[3].mxu0  ;;  %v281_v37 = vmax.f32 %v275_v32, 0.0  ;;  %v1229_v34 = vld [vmem:[#allocation13 + $0x30] sm:$0xff]  }
 0x18c   :  { %v1231_v36 = vld [vmem:[#allocation14] sm:$0xff]  }
 0x18d   :  { %v282_v38 = vmax.f32 %v278_v35, 0.0  ;;  %v1230_v35 = vld [vmem:[#allocation13 + $0x38] sm:$0xff]  }
 0x18f   :  { %v283_v39 = vpack.c.bf16 %v282_v38, %v281_v37  ;;  %v1232_v37 = vld [vmem:[#allocation14 + $0x8] sm:$0xff]   ;;  %v1233_v38 = vld [vmem:[#allocation14 + $0x10] sm:$0xff]  }
 0x191   :  { %1092 = vmatmul.mubr.bf16.vlgmr.msra.gmra.mrb[0].mxu1 %v283_v39  ;;  %v1234_v39 = vld [vmem:[#allocation14 + $0x18] sm:$0xff]  }
 0x192   :  { %1111 = vmatprep.mubr.msk.bf16.mxu1 %vm1490_vm0, %v1489_v0  ;;  %1096 = vmatpush3.bf16.msra.mxu1 %v1215_v45 }
 0x193   :  { %1097 = vmatprep.subr.bf16.mxu1 %v1489_v0 }
 0x196   :  { %1098 = vmatpush3.bf16.msra.mxu1 %v1216_v56 }
 0x197   :  { %1099 = vmatprep.subr.bf16.mxu1 %v1489_v0 }
 0x19a   :  { %1100 = vmatpush3.bf16.msra.mxu1 %v1217_v57 }
 0x19b   :  { %1101 = vmatprep.subr.bf16.mxu1 %v1489_v0 }
 0x19e   :  { %1102 = vmatpush3.bf16.msra.mxu1 %v1218_v58 }
 0x19f   :  { %1103 = vmatprep.subr.bf16.mxu1 %v1489_v0 }
 0x1a2   :  { %1104 = vmatpush3.bf16.msra.mxu1 %v1219_v59 }
 0x1a3   :  { %1105 = vmatprep.subr.bf16.mxu1 %v1489_v0 }
 0x1a6   :  { %1106 = vmatpush3.bf16.msra.mxu1 %v1220_v60 }
 0x1a7   :  { %1107 = vmatprep.subr.bf16.mxu1 %v1489_v0 }
 0x1aa   :  { %1108 = vmatpush3.bf16.msra.mxu1 %v1221_v61 }
 0x1ab   :  { %1109 = vmatprep.subr.bf16.mxu1 %v1489_v0 }
 0x1ae   :  { %1110 = vmatpush3.bf16.msra.mxu1 %v1222_v62 }
 0x1af   :  { %1135 = vmatprep.subr.bf16.mxu1 %v1489_v0 }
 0x264   :  { %v389_v47 = vpop.f32.mrb[0].mxu1 }
 0x265   :  { %v390_v48 = vadd.f32 %v958_v46, %v389_v47  ;;  %v1093_v49 = vpop.f32.mrb[1].mxu1 }
 0x266   :  { %v392_v50 = vpop.f32.mrb[2].mxu1 }
 0x267   :  { %v393_v51 = vadd.f32 %v958_v46, %v392_v50  ;;  %v1094_v52 = vpop.f32.mrb[3].mxu1  ;;  %v396_v53 = vmax.f32 %v390_v48, 0.0 }
 0x268   :  { %v1237_v52 = vld [vmem:[#allocation14 + $0x30] sm:$0xff]  }
 0x269   :  { %v397_v54 = vmax.f32 %v393_v51, 0.0 }
 0x26b   :  { %v398_v55 = vpack.c.bf16 %v397_v54, %v396_v53  ;;  %v1238_v53 = vld [vmem:[#allocation14 + $0x38] sm:$0xff]   ;;  %v992_v54 = vld [vmem:[%s1802_s11] ss:$0 sm:$0xff] }
 0x26d   :  { %540 = vmatmul.mubr.bf16.vlgmr.msra.gmra.mrb[4].mxu0 %v398_v55 }
 0x26e   :  { %1131 = vmatprep.mubr.msk.bf16.mxu0 %vm1490_vm0, %v1489_v0  ;;  %1116 = vmatpush3.bf16.msra.mxu0 %v1223_v63 }
 0x26f   :  { %1117 = vmatprep.subr.bf16.mxu0 %v1489_v0 }
 0x272   :  { %1118 = vmatpush3.bf16.msra.mxu0 %v1224_v1 }
 0x273   :  { %1119 = vmatprep.subr.bf16.mxu0 %v1489_v0 }
 0x276   :  { %1120 = vmatpush3.bf16.msra.mxu0 %v1225_v2 }
 0x277   :  { %1121 = vmatprep.subr.bf16.mxu0 %v1489_v0 }
 0x27a   :  { %1122 = vmatpush3.bf16.msra.mxu0 %v1226_v3 }
 0x27b   :  { %1123 = vmatprep.subr.bf16.mxu0 %v1489_v0 }
 0x27e   :  { %1124 = vmatpush3.bf16.msra.mxu0 %v1227_v4 }
 0x27f   :  { %1125 = vmatprep.subr.bf16.mxu0 %v1489_v0 }
 0x282   :  { %1126 = vmatpush3.bf16.msra.mxu0 %v1228_v5 }
 0x283   :  { %1127 = vmatprep.subr.bf16.mxu0 %v1489_v0 }
 0x286   :  { %1128 = vmatpush3.bf16.msra.mxu0 %v1229_v34 }
 0x287   :  { %1129 = vmatprep.subr.bf16.mxu0 %v1489_v0 }
 0x28a   :  { %1130 = vmatpush3.bf16.msra.mxu0 %v1230_v35 }
 0x340   :  { %v541_v13 = vpop.f32.mrb[4].mxu0 }
 0x341   :  { %v542_v14 = vadd.f32 %v541_v13, %v420_v11  ;;  %v543_v15 = vpop.f32.mrb[5].mxu0 }
 0x342   :  { %v544_v16 = vadd.f32 %v543_v15, %v424_v12  ;;  %v545_v17 = vpop.f32.mrb[6].mxu0 }
 0x343   :  { %907 = vst [vmem:[#allocation17] sm:$0xff] %v542_v14  ;;  %v546_v18 = vadd.f32 %v545_v17, %v420_v11  ;;  %v547_v19 = vpop.f32.mrb[7].mxu0 }
 0x344   :  { %v550_v20 = vmul.f32 0.5, %v544_v16  ;;  %908 = vst [vmem:[#allocation17 + $0x8] sm:$0xff] %v544_v16  ;;  %v548_v21 = vadd.f32 %v547_v19, %v424_v12 }
 0x345   :  { %909 = vst [vmem:[#allocation17 + $0x10] sm:$0xff] %v546_v18 }
 0x346   :  { %v552_v22 = vmul.f32 1.442695, %v550_v20  ;;  %v551_v23 = vmul.f32 0.5, %v548_v21  ;;  %910 = vst [vmem:[#allocation17 + $0x18] sm:$0xff] %v548_v21 }
 0x348   :  { %1239 = vpow2.f32 %v552_v22  ;;  %v554_v24 = vmul.f32 1.442695, %v551_v23 }
 0x34a   :  { %1241 = vpow2.f32 %v554_v24 }
 0x352   :  { %v1240_v26 = vpop.eup %1239 }
 0x353   :  { %v558_v28 = vmul.f32 %v1240_v26, %v556_v25 }
 0x354   :  { %v1242_v29 = vpop.eup %1241 }
 0x355   :  { %v559_v30 = vmul.f32 %v1242_v29, %v557_v27  ;;  %v560_v31 = vadd.f32 %v558_v28, %v542_v14 }
 0x357   :  { %v561_v32 = vadd.f32 %v559_v30, %v546_v18 }
 0x359   :  { %v562_v33 = vpack.c.bf16 %v561_v32, %v560_v31 }
 0x35b   :  { %1112 = vmatmul.mubr.bf16.vlgmr.msra.gmra.mrb[4].mxu1 %v562_v33 }
 0x35c   :  { %1151 = vmatprep.mubr.msk.bf16.mxu1 %vm1490_vm0, %v1489_v0  ;;  %1136 = vmatpush3.bf16.msra.mxu1 %v1231_v36 }
 0x35d   :  { %1137 = vmatprep.subr.bf16.mxu1 %v1489_v0 }
 0x360   :  { %1138 = vmatpush3.bf16.msra.mxu1 %v1232_v37 }
 0x361   :  { %1139 = vmatprep.subr.bf16.mxu1 %v1489_v0 }
 0x364   :  { %1140 = vmatpush3.bf16.msra.mxu1 %v1233_v38 }
 0x365   :  { %1141 = vmatprep.subr.bf16.mxu1 %v1489_v0 }
 0x368   :  { %1142 = vmatpush3.bf16.msra.mxu1 %v1234_v39 }
 0x369   :  { %1143 = vmatprep.subr.bf16.mxu1 %v1489_v0 }
 0x36c   :  { %1144 = vmatpush3.bf16.msra.mxu1 %v1235_v40 }
 0x36d   :  { %1145 = vmatprep.subr.bf16.mxu1 %v1489_v0 }
 0x370   :  { %1146 = vmatpush3.bf16.msra.mxu1 %v1236_v41 }
 0x371   :  { %1147 = vmatprep.subr.bf16.mxu1 %v1489_v0 }
 0x374   :  { %1148 = vmatpush3.bf16.msra.mxu1 %v1237_v52 }
 0x375   :  { %1149 = vmatprep.subr.bf16.mxu1 %v1489_v0 }
 0x378   :  { %1150 = vmatpush3.bf16.msra.mxu1 %v1238_v53 }
 0x42e   :  { %v668_v43 = vpop.f32.mrb[4].mxu1 }
 0x42f   :  { %v669_v44 = vadd.f32 %v983_v42, %v668_v43  ;;  %v1113_v45 = vpop.f32.mrb[5].mxu1 }
 0x430   :  { %v671_v46 = vpop.f32.mrb[6].mxu1 }
 0x431   :  { %v672_v47 = vadd.f32 %v983_v42, %v671_v46  ;;  %v1114_v48 = vpop.f32.mrb[7].mxu1  ;;  %v675_v49 = vmax.f32 %v669_v44, 0.0 }
 0x433   :  { %v676_v50 = vmax.f32 %v672_v47, 0.0 }
 0x435   :  { %v677_v51 = vpack.c.bf16 %v676_v50, %v675_v49 }
 0x437   :  { %1132 = vmatmul.mubr.bf16.vlgmr.msra.gmra.mrb[8].mxu0 %v677_v51 }
 0x50a   :  { %v783_v55 = vpop.f32.mrb[8].mxu0 }
 0x50b   :  { %v784_v56 = vadd.f32 %v992_v54, %v783_v55  ;;  %v1133_v57 = vpop.f32.mrb[9].mxu0 }
 0x50c   :  { %v786_v58 = vpop.f32.mrb[10].mxu0 }
 0x50d   :  { %v787_v59 = vadd.f32 %v992_v54, %v786_v58  ;;  %v1134_v60 = vpop.f32.mrb[11].mxu0  ;;  %v790_v61 = vmax.f32 %v784_v56, 0.0 }
 0x50f   :  { %v791_v62 = vmax.f32 %v787_v59, 0.0 }
 0x511   :  { %v792_v63 = vpack.c.bf16 %v791_v62, %v790_v61 }
 0x513   :  { %1152 = vmatmul.mubr.bf16.vlgmr.msra.gmra.mrb[8].mxu1 %v792_v63 }
 0x514   :  { %1430 = shalt.err (!%p1427_p12)
}
 0x515   :  { %s1431_s17 = scalar_lea.hbm %s1806_s15, 512 }
 0x516   :  { %p1432_p13 = scmp.ne.s32.totalorder %s1806_s15, %s1431_s17  ;;  %p1435_p0 = scmp.lt.u32.totalorder %s1431_s17, %s1806_s15 }
 0x518   :  { %p1437_p1 = pnand %p1435_p0, %p1432_p13 }
 0x51a   :  { %1440 = shalt.err (!%p1437_p1)
}
 0x51b   :  { %s1493_s14 = smov 256   ;;  %s1494_s24 = smov 16   ;;  %v1001_v0 = vld [vmem:[%s1804_s13] ss:$0 sm:$0xff] }
 0x51c   :  { %934 = dma.vmem_to_hbm [thread:$0]  %s929_s1, 512, %s1806_s15, [#allocation18], %s1493_s14, %s1493_s14, %s1494_s24  }
 0x51d   :  { %s1495_s21 = smov [#allocation16]  }
 0x51e   :  { %s916_s12 = sshll.u32 %s1495_s21, 4  ;;  %s917_s12 = int_to_ptr.vmem [resolvable:$true] %s916_s12 }
 0x51f   :  { %s1441_s19 = scalar_lea.vmem %s917_s12, 256  ;;  %p1446_p3 = scmp.lt.s32.totalorder %s917_s12, %s917_s12 }
 0x520   :  { %p1442_p2 = scmp.ne.s32.totalorder %s917_s12, %s1441_s19  ;;  %p1447_p4 = scmp.lt.s32.totalorder %s1441_s19, %s1441_s19 }
 0x522   :  { %p1448_p5 = por %p1447_p4, %p1446_p3 }
 0x524   :  { %p1449_p6 = pnand %p1448_p5, %p1442_p2 }
 0x5e6   :  { %v898_v1 = vpop.f32.mrb[8].mxu1 }
 0x5e7   :  { %v899_v2 = vadd.f32 %v1001_v0, %v898_v1  ;;  %v1153_v3 = vpop.f32.mrb[9].mxu1 }
 0x5e8   :  { %v901_v4 = vpop.f32.mrb[10].mxu1 }
 0x5e9   :  { %905 = vst [vmem:[#allocation16] sm:$0xff] %v899_v2  ;;  %v902_v5 = vadd.f32 %v1001_v0, %v901_v4  ;;  %v1154_v6 = vpop.f32.mrb[11].mxu1 }
 0x5eb   :  { %906 = vst [vmem:[#allocation16 + $0x8] sm:$0xff] %v902_v5 }
 0x5ec   :  { %1452 = shalt.err (!%p1449_p6)
}
 0x5ed   :  { %s1809_s3 = sld [smem:[#allocation26_spill]] }
 0x5f3   :  { %s1453_s30 = scalar_lea.hbm %s1809_s3, 256 }
 0x5f4   :  { %p1454_p7 = scmp.ne.s32.totalorder %s1809_s3, %s1453_s30  ;;  %p1457_p8 = scmp.lt.u32.totalorder %s1453_s30, %s1809_s3 }
 0x5f6   :  { %p1459_p9 = pnand %p1457_p8, %p1454_p7 }
 0x5f8   :  { %1462 = shalt.err (!%p1459_p9)
}
 0x5f9   :  { %922 = dma.vmem_to_hbm [thread:$0]  %s917_s12, 256, %s1809_s3, [#allocation4], %s1478_s28, %s1478_s28, %s1479_s29  }
 0x5fa   :  { %1473 = dma.done.wait [#allocation4], 256  }
 0x5fb   :  { %1474 = vsyncadd [#allocation4], 4294967040 }
 0x5fc   :  { %1475 = dma.done.wait [#allocation18], 512  }
 0x5fd   :  { %1476 = vsyncadd [#allocation18], 4294966784 }
 0x5fe   :  { %941 = vsyncpa [#allocation3], 1 }
 0x5ff   :  { %942 = vsyncpa [#allocation6], 1 }
 0x600   :  { %943 = vsyncpa [#allocation9], 1 }
 0x601   :  { %944 = vsyncpa [#allocation12], 1 }
 0x602   :  { %945 = vsyncpa [#allocation15], 1 }
 0x603   :  { %946 = vsyncpa [#allocation4], 1 }
 0x604   :  { %947 = vsyncpa [#allocation18], 1 }

// kernel: tpu_custom_call.1
= control target key start
LH: loop header
LB: loop body
LE: loop exit
PB: predicated region body
PF: predicated region fallthrough
CT: control target
= control target key end

     0   :  { %s1791_s0 = inlined_call_operand.hbm [shape: bf16[16,128], index: 0, kind: input, shape index: {}]   ;;  %s1792_s1 = inlined_call_operand.hbm [shape: f32[16,128], index: 1, kind: input, shape index: {}]   ;;  %s1793_s2 = inlined_call_operand.hbm [shape: bf16[128,128], index: 2, kind: input, shape index: {}]   ;;  %s1794_s3 = inlined_call_operand.vmem [shape: f32[1,128], index: 3, kind: input, shape index: {}]   ;;  %s1795_s4 = inlined_call_operand.hbm [shape: bf16[128,128], index: 4, kind: input, shape index: {}]   ;;  %s1796_s5 = inlined_call_operand.vmem [shape: f32[1,128], index: 5, kind: input, shape index: {}]   ;;  %s1797_s6 = inlined_call_operand.hbm [shape: bf16[128,256], index: 6, kind: input, shape index: {}]   ;;  %s1798_s7 = inlined_call_operand.vmem [shape: f32[1,256], index: 7, kind: input, shape index: {}]   ;;  %s1799_s8 = inlined_call_operand.hbm [shape: bf16[128,128], index: 8, kind: input, shape index: {}]   ;;  %s1800_s9 = inlined_call_operand.vmem [shape: f32[1,128], index: 9, kind: input, shape index: {}]   ;;  %s1801_s10 = inlined_call_operand.hbm [shape: bf16[128,128], index: 10, kind: input, shape index: {}]   ;;  %s1802_s11 = inlined_call_operand.vmem [shape: f32[1,128], index: 11, kind: input, shape index: {}]   ;;  %s1803_s12 = inlined_call_operand.hbm [shape: bf16[128,128], index: 12, kind: input, shape index: {}]   ;;  %s1804_s13 = inlined_call_operand.vmem [shape: f32[1,128], index: 13, kind: input, shape index: {}]   ;;  %s1805_s14 = inlined_call_operand.hbm [shape: f32[16,128], index: 14, kind: output, shape index: {0}]   ;;  %s1806_s15 = inlined_call_operand.hbm [shape: f32[16,256], index: 15, kind: output, shape index: {1}]  }
   0x1   :  { %1808 = sst [smem:[#allocation26_spill]] %s1805_s14 }
   0x2   :  { %21 = vsyncpa [#allocation3], 0 }
   0x3   :  { %22 = vsyncpa [#allocation6], 0 }
   0x4   :  { %23 = vsyncpa [#allocation9], 0 }
   0x5   :  { %24 = vsyncpa [#allocation12], 0 }
   0x6   :  { %25 = vsyncpa [#allocation15], 0 }
   0x7   :  { %26 = vsyncpa [#allocation4], 0 }
   0x8   :  { %27 = vsyncpa [#allocation18], 0  ;;  %s1477_s18 = smov [#allocation5]   ;;  %s1243_s22 = scalar_lea.hbm %s1792_s1, 256 }
   0x9   :  { %s45_s19 = sshll.u32 %s1477_s18, 4  ;;  %p1244_p0 = scmp.ne.s32.totalorder %s1792_s1, %s1243_s22  ;;  %s46_s19 = int_to_ptr.vmem [resolvable:$true] %s45_s19 }
   0xa   :  { %p1247_p1 = scmp.lt.u32.totalorder %s1243_s22, %s1792_s1 }
   0xc   :  { %p1249_p2 = pnand %p1247_p1, %p1244_p0 }
   0xe   :  { %1252 = shalt.err (!%p1249_p2)
}
   0xf   :  { %s1253_s27 = scalar_lea.vmem %s46_s19, 256  ;;  %p1258_p4 = scmp.lt.s32.totalorder %s46_s19, %s46_s19 }
  0x10   :  { %p1254_p3 = scmp.ne.s32.totalorder %s46_s19, %s1253_s27  ;;  %p1259_p5 = scmp.lt.s32.totalorder %s1253_s27, %s1253_s27 }
  0x12   :  { %p1260_p6 = por %p1259_p5, %p1258_p4 }
  0x14   :  { %p1261_p7 = pnand %p1260_p6, %p1254_p3 }
  0x16   :  { %1264 = shalt.err (!%p1261_p7)
}
  0x17   :  { %s1478_s28 = smov 128   ;;  %s1479_s29 = smov 8  }
  0x18   :  { %51 = dma.hbm_to_vmem [thread:$0]  %s1792_s1, 256, %s46_s19, [#allocation6], %s1478_s28, %s1478_s28, %s1479_s29  }
  0x19   :  { %s1480_s17 = smov [#allocation8]   ;;  %s1481_s20 = smov [#allocation11]  }
  0x1a   :  { %s71_s18 = sshll.u32 %s1480_s17, 4  ;;  %s99_s21 = sshll.u32 %s1481_s20, 4  ;;  %s72_s18 = int_to_ptr.vmem [resolvable:$true] %s71_s18  ;;  %s100_s21 = int_to_ptr.vmem [resolvable:$true] %s99_s21 }
  0x1b   :  { %s1265_s24 = scalar_lea.hbm %s1795_s4, 1024 }
  0x1c   :  { %p1266_p8 = scmp.ne.s32.totalorder %s1795_s4, %s1265_s24  ;;  %p1269_p9 = scmp.lt.u32.totalorder %s1265_s24, %s1795_s4 }
  0x1e   :  { %p1271_p10 = pnand %p1269_p9, %p1266_p8 }
  0x20   :  { %1274 = shalt.err (!%p1271_p10)
}
  0x21   :  { %s1275_s1 = scalar_lea.vmem %s72_s18, 1024  ;;  %p1280_p12 = scmp.lt.s32.totalorder %s72_s18, %s72_s18 }
  0x22   :  { %p1276_p11 = scmp.ne.s32.totalorder %s72_s18, %s1275_s1  ;;  %p1281_p13 = scmp.lt.s32.totalorder %s1275_s1, %s1275_s1 }
  0x24   :  { %p1282_p0 = por %p1281_p13, %p1280_p12 }
  0x26   :  { %p1283_p1 = pnand %p1282_p0, %p1276_p11 }
  0x28   :  { %1286 = shalt.err (!%p1283_p1)
}
  0x29   :  { %s1482_s19 = smov 64   ;;  %s1483_s30 = smov 4  }
  0x2a   :  { %77 = dma.hbm_to_vmem [thread:$0]  %s1795_s4, 1024, %s72_s18, [#allocation9], %s1482_s19, %s1482_s19, %s1483_s30  }
  0x2b   :  { %s1287_s22 = scalar_lea.hbm %s1799_s8, 1024 }
  0x2c   :  { %p1288_p2 = scmp.ne.s32.totalorder %s1799_s8, %s1287_s22  ;;  %p1291_p3 = scmp.lt.u32.totalorder %s1287_s22, %s1799_s8 }
  0x2e   :  { %p1293_p4 = pnand %p1291_p3, %p1288_p2 }
  0x30   :  { %1296 = shalt.err (!%p1293_p4)
}
  0x31   :  { %s1297_s27 = scalar_lea.vmem %s100_s21, 1024  ;;  %p1302_p6 = scmp.lt.s32.totalorder %s100_s21, %s100_s21 }
  0x32   :  { %p1298_p5 = scmp.ne.s32.totalorder %s100_s21, %s1297_s27  ;;  %p1303_p7 = scmp.lt.s32.totalorder %s1297_s27, %s1297_s27 }
  0x34   :  { %p1304_p8 = por %p1303_p7, %p1302_p6 }
  0x36   :  { %p1305_p9 = pnand %p1304_p8, %p1298_p5 }
  0x38   :  { %1308 = shalt.err (!%p1305_p9)
}
  0x39   :  { %105 = dma.hbm_to_vmem [thread:$0]  %s1799_s8, 1024, %s100_s21, [#allocation12], %s1482_s19, %s1482_s19, %s1483_s30  }
  0x3a   :  { %s1484_s1 = smov [#allocation2]   ;;  %s1485_s17 = smov [#allocation7]  }
  0x3b   :  { %s33_s16 = sshll.u32 %s1484_s1, 4  ;;  %s57_s14 = sshll.u32 %s1485_s17, 4  ;;  %s34_s16 = int_to_ptr.vmem [resolvable:$true] %s33_s16  ;;  %s58_s14 = int_to_ptr.vmem [resolvable:$true] %s57_s14 }
  0x3c   :  { %s1309_s23 = scalar_lea.hbm %s1791_s0, 128 }
  0x3d   :  { %p1310_p10 = scmp.ne.s32.totalorder %s1791_s0, %s1309_s23  ;;  %p1313_p11 = scmp.lt.u32.totalorder %s1309_s23, %s1791_s0 }
  0x3f   :  { %p1315_p12 = pnand %p1313_p11, %p1310_p10 }
  0x41   :  { %1318 = shalt.err (!%p1315_p12)
}
  0x42   :  { %s1319_s8 = scalar_lea.vmem %s34_s16, 128  ;;  %p1324_p0 = scmp.lt.s32.totalorder %s34_s16, %s34_s16 }
  0x43   :  { %p1320_p13 = scmp.ne.s32.totalorder %s34_s16, %s1319_s8  ;;  %p1325_p1 = scmp.lt.s32.totalorder %s1319_s8, %s1319_s8 }
  0x45   :  { %p1326_p2 = por %p1325_p1, %p1324_p0 }
  0x47   :  { %p1327_p3 = pnand %p1326_p2, %p1320_p13 }
  0x49   :  { %1330 = shalt.err (!%p1327_p3)
}
  0x4a   :  { %39 = dma.hbm_to_vmem [thread:$0]  %s1791_s0, 128, %s34_s16, [#allocation3], %s1482_s19, %s1482_s19, %s1483_s30  }
  0x4b   :  { %s1331_s17 = scalar_lea.hbm %s1793_s2, 1024 }
  0x4c   :  { %p1332_p4 = scmp.ne.s32.totalorder %s1793_s2, %s1331_s17  ;;  %p1335_p5 = scmp.lt.u32.totalorder %s1331_s17, %s1793_s2 }
  0x4e   :  { %p1337_p6 = pnand %p1335_p5, %p1332_p4 }
  0x50   :  { %1340 = shalt.err (!%p1337_p6)
}
  0x51   :  { %s1341_s25 = scalar_lea.vmem %s58_s14, 1024  ;;  %p1346_p8 = scmp.lt.s32.totalorder %s58_s14, %s58_s14 }
  0x52   :  { %p1342_p7 = scmp.ne.s32.totalorder %s58_s14, %s1341_s25  ;;  %p1347_p9 = scmp.lt.s32.totalorder %s1341_s25, %s1341_s25 }
  0x54   :  { %p1348_p10 = por %p1347_p9, %p1346_p8 }
  0x56   :  { %p1349_p11 = pnand %p1348_p10, %p1342_p7 }
  0x58   :  { %1352 = shalt.err (!%p1349_p11)
}
  0x59   :  { %63 = dma.hbm_to_vmem [thread:$0]  %s1793_s2, 1024, %s58_s14, [#allocation6], %s1482_s19, %s1482_s19, %s1483_s30  }
  0x5a   :  { %s1486_s26 = smov [#allocation10]   ;;  %s1487_s8 = smov [#allocation13]  }
  0x5b   :  { %s85_s27 = sshll.u32 %s1486_s26, 4  ;;  %s113_s21 = sshll.u32 %s1487_s8, 4  ;;  %s86_s27 = int_to_ptr.vmem [resolvable:$true] %s85_s27  ;;  %s114_s21 = int_to_ptr.vmem [resolvable:$true] %s113_s21 }
  0x5c   :  { %s1353_s1 = scalar_lea.hbm %s1797_s6, 2048 }
  0x5d   :  { %p1354_p12 = scmp.ne.s32.totalorder %s1797_s6, %s1353_s1  ;;  %p1357_p13 = scmp.lt.u32.totalorder %s1353_s1, %s1797_s6 }
  0x5f   :  { %p1359_p0 = pnand %p1357_p13, %p1354_p12 }
  0x61   :  { %1362 = shalt.err (!%p1359_p0)
}
  0x62   :  { %s1363_s2 = scalar_lea.vmem %s86_s27, 2048  ;;  %p1368_p2 = scmp.lt.s32.totalorder %s86_s27, %s86_s27 }
  0x63   :  { %p1364_p1 = scmp.ne.s32.totalorder %s86_s27, %s1363_s2  ;;  %p1369_p3 = scmp.lt.s32.totalorder %s1363_s2, %s1363_s2 }
  0x65   :  { %p1370_p4 = por %p1369_p3, %p1368_p2 }
  0x67   :  { %p1371_p5 = pnand %p1370_p4, %p1364_p1 }
  0x69   :  { %1374 = shalt.err (!%p1371_p5)
}
  0x6a   :  { %91 = dma.hbm_to_vmem [thread:$0]  %s1797_s6, 2048, %s86_s27, [#allocation9], %s1478_s28, %s1478_s28, %s1479_s29  }
  0x6b   :  { %s1375_s16 = scalar_lea.hbm %s1801_s10, 1024 }
  0x6c   :  { %p1376_p6 = scmp.ne.s32.totalorder %s1801_s10, %s1375_s16  ;;  %p1379_p7 = scmp.lt.u32.totalorder %s1375_s16, %s1801_s10 }
  0x6e   :  { %p1381_p8 = pnand %p1379_p7, %p1376_p6 }
  0x70   :  { %1384 = shalt.err (!%p1381_p8)
}
  0x71   :  { %s1385_s1 = scalar_lea.vmem %s114_s21, 1024  ;;  %p1390_p10 = scmp.lt.s32.totalorder %s114_s21, %s114_s21 }
  0x72   :  { %p1386_p9 = scmp.ne.s32.totalorder %s114_s21, %s1385_s1  ;;  %p1391_p11 = scmp.lt.s32.totalorder %s1385_s1, %s1385_s1 }
  0x74   :  { %p1392_p12 = por %p1391_p11, %p1390_p10 }
  0x76   :  { %p1393_p13 = pnand %p1392_p12, %p1386_p9 }
  0x78   :  { %1396 = shalt.err (!%p1393_p13)
}
  0x79   :  { %119 = dma.hbm_to_vmem [thread:$0]  %s1801_s10, 1024, %s114_s21, [#allocation12], %s1482_s19, %s1482_s19, %s1483_s30  }
  0x7a   :  { %s1488_s17 = smov [#allocation14]   ;;  %s1397_s2 = scalar_lea.hbm %s1803_s12, 1024 }
  0x7b   :  { %s127_s20 = sshll.u32 %s1488_s17, 4  ;;  %p1398_p0 = scmp.ne.s32.totalorder %s1803_s12, %s1397_s2  ;;  %s128_s20 = int_to_ptr.vmem [resolvable:$true] %s127_s20 }
  0x7c   :  { %p1401_p1 = scmp.lt.u32.totalorder %s1397_s2, %s1803_s12 }
  0x7e   :  { %p1403_p2 = pnand %p1401_p1, %p1398_p0 }
  0x80   :  { %1406 = shalt.err (!%p1403_p2)
}
  0x81   :  { %s1407_s16 = scalar_lea.vmem %s128_s20, 1024  ;;  %p1412_p4 = scmp.lt.s32.totalorder %s128_s20, %s128_s20 }
  0x82   :  { %p1408_p3 = scmp.ne.s32.totalorder %s128_s20, %s1407_s16  ;;  %p1413_p5 = scmp.lt.s32.totalorder %s1407_s16, %s1407_s16 }
  0x84   :  { %p1414_p6 = por %p1413_p5, %p1412_p4 }
  0x86   :  { %p1415_p7 = pnand %p1414_p6, %p1408_p3 }
  0x88   :  { %1418 = shalt.err (!%p1415_p7)
}
  0x89   :  { %133 = dma.hbm_to_vmem [thread:$0]  %s1803_s12, 1024, %s128_s20, [#allocation15], %s1482_s19, %s1482_s19, %s1483_s30  }
  0x8a   :  { %1463 = dma.done.wait [#allocation3], 128  }
  0x8b   :  { %1464 = vsyncadd [#allocation3], 4294967168 }
  0x8c   :  { %1465 = dma.done.wait [#allocation6], 1280  }
  0x8d   :  { %1466 = vsyncadd [#allocation6], 4294966016 }
  0x8e   :  { %1467 = dma.done.wait [#allocation9], 3072  }
  0x8f   :  { %1468 = vsyncadd [#allocation9], 4294964224 }
  0x90   :  { %1469 = dma.done.wait [#allocation12], 2048  }
  0x91   :  { %1470 = vsyncadd [#allocation12], 4294965248 }
  0x92   :  { %1471 = dma.done.wait [#allocation15], 1024  }
  0x93   :  { %1472 = vsyncadd [#allocation15], 4294966272  ;;  %v1489_v0 = vmov 0.0   ;;  %vm1490_vm0 = vmmov 0   ;;  %v1174_v1 = vld [vmem:[#allocation7] sm:$0xff]   ;;  %v1175_v2 = vld [vmem:[#allocation7 + $0x8] sm:$0xff]  }
  0x94   :  { %1055 = vmatprep.subr.bf16.mxu0 %v1489_v0  ;;  %1071 = vmatprep.mubr.msk.bf16.mxu0 %vm1490_vm0, %v1489_v0  ;;  %v1176_v3 = vld [vmem:[#allocation7 + $0x10] sm:$0xff]   ;;  %v1183_v4 = vld [vmem:[#allocation8] sm:$0xff]   ;;  %v1177_v5 = vld [vmem:[#allocation7 + $0x18] sm:$0xff]   ;;  %v1491_v44 = vmov 0  }
  0x95   :  { %1075 = vmatprep.subr.bf16.mxu1 %v1489_v0  ;;  %1091 = vmatprep.mubr.msk.bf16.mxu1 %vm1490_vm0, %v1489_v0  ;;  %v1184_v6 = vld [vmem:[#allocation8 + $0x8] sm:$0xff]   ;;  %v1178_v7 = vld [vmem:[#allocation7 + $0x20] sm:$0xff]   ;;  %v1185_v8 = vld [vmem:[#allocation8 + $0x10] sm:$0xff]  }
  0x96   :  { %1056 = vmatpush3.bf16.msra.mxu0 %v1174_v1  ;;  %1076 = vmatpush3.bf16.msra.mxu1 %v1183_v4  ;;  %v1179_v9 = vld [vmem:[#allocation7 + $0x28] sm:$0xff]   ;;  %v1186_v10 = vld [vmem:[#allocation8 + $0x18] sm:$0xff]   ;;  %v1180_v11 = vld [vmem:[#allocation7 + $0x30] sm:$0xff]  }
  0x97   :  { %1057 = vmatprep.subr.bf16.mxu0 %v1489_v0  ;;  %1077 = vmatprep.subr.bf16.mxu1 %v1489_v0  ;;  %v1187_v12 = vld [vmem:[#allocation8 + $0x20] sm:$0xff]   ;;  %v1181_v13 = vld [vmem:[#allocation7 + $0x38] sm:$0xff]   ;;  %v1188_v14 = vld [vmem:[#allocation8 + $0x28] sm:$0xff]  }
  0x98   :  { %v1182_v15 = vld [vmem:[#allocation2] sm:$0xff]   ;;  %v1189_v16 = vld [vmem:[#allocation8 + $0x30] sm:$0xff]   ;;  %v1190_v17 = vld [vmem:[#allocation8 + $0x38] sm:$0xff]  }
  0x99   :  { %v1191_v18 = vld [vmem:[#allocation10] ss:$8 sps:$4 sm:$0xff]   ;;  %v1193_v19 = vld [vmem:[#allocation10 + $0x4] ss:$8 sps:$4 sm:$0xff]   ;;  %v1196_v20 = vld [vmem:[#allocation10 + $0x14] ss:$8 sps:$4 sm:$0xff]  }
  0x9a   :  { %1058 = vmatpush3.bf16.msra.mxu0 %v1175_v2  ;;  %1078 = vmatpush3.bf16.msra.mxu1 %v1184_v6  ;;  %v1194_v21 = vld [vmem:[#allocation10 + $0x10] ss:$8 sps:$4 sm:$0xff]   ;;  %v1199_v22 = vld [vmem:[#allocation10 + $0x24] ss:$8 sps:$4 sm:$0xff]   ;;  %v1197_v23 = vld [vmem:[#allocation10 + $0x20] ss:$8 sps:$4 sm:$0xff]   ;;  %v417_v6 = vlaneseq }
  0x9b   :  { %1059 = vmatprep.subr.bf16.mxu0 %v1489_v0  ;;  %1079 = vmatprep.subr.bf16.mxu1 %v1489_v0  ;;  %v1202_v24 = vld [vmem:[#allocation10 + $0x34] ss:$8 sps:$4 sm:$0xff]   ;;  %v1200_v25 = vld [vmem:[#allocation10 + $0x30] ss:$8 sps:$4 sm:$0xff]   ;;  %v1205_v26 = vld [vmem:[#allocation10 + $0x44] ss:$8 sps:$4 sm:$0xff]  }
  0x9c   :  { %v1203_v27 = vld [vmem:[#allocation10 + $0x40] ss:$8 sps:$4 sm:$0xff]   ;;  %v1208_v28 = vld [vmem:[#allocation10 + $0x54] ss:$8 sps:$4 sm:$0xff]   ;;  %v1206_v29 = vld [vmem:[#allocation10 + $0x50] ss:$8 sps:$4 sm:$0xff]  }
  0x9d   :  { %v948_v30 = vld [vmem:[%s1794_s3] ss:$0 sm:$0xff]  ;;  %v1211_v40 = vld [vmem:[#allocation10 + $0x64] ss:$8 sps:$4 sm:$0xff]   ;;  %v1214_v42 = vld [vmem:[#allocation10 + $0x74] ss:$8 sps:$4 sm:$0xff]  }
  0x9e   :  { %1060 = vmatpush3.bf16.msra.mxu0 %v1176_v3  ;;  %1080 = vmatpush3.bf16.msra.mxu1 %v1185_v8  ;;  %v1209_v41 = vld [vmem:[#allocation10 + $0x60] ss:$8 sps:$4 sm:$0xff]   ;;  %v1212_v43 = vld [vmem:[#allocation10 + $0x70] ss:$8 sps:$4 sm:$0xff]  }
  0x9f   :  { %1061 = vmatprep.subr.bf16.mxu0 %v1489_v0  ;;  %1081 = vmatprep.subr.bf16.mxu1 %v1489_v0  ;;  %v1215_v45 = vld [vmem:[#allocation11] sm:$0xff]   ;;  %v958_v46 = vld [vmem:[%s1796_s5] ss:$0 sm:$0xff]  ;;  %v1217_v57 = vld [vmem:[#allocation11 + $0x10] sm:$0xff]  }
  0xa0   :  { %v1216_v56 = vld [vmem:[#allocation11 + $0x8] sm:$0xff]   ;;  %v1218_v58 = vld [vmem:[#allocation11 + $0x18] sm:$0xff]   ;;  %v1219_v59 = vld [vmem:[#allocation11 + $0x20] sm:$0xff]  }
  0xa1   :  { %v1220_v60 = vld [vmem:[#allocation11 + $0x28] sm:$0xff]   ;;  %v1221_v61 = vld [vmem:[#allocation11 + $0x30] sm:$0xff]   ;;  %v1222_v62 = vld [vmem:[#allocation11 + $0x38] sm:$0xff]  }
  0xa2   :  { %1062 = vmatpush3.bf16.msra.mxu0 %v1177_v5  ;;  %1082 = vmatpush3.bf16.msra.mxu1 %v1186_v10  ;;  %v1223_v63 = vld [vmem:[#allocation13] sm:$0xff]   ;;  %v1224_v1 = vld [vmem:[#allocation13 + $0x8] sm:$0xff]   ;;  %v1225_v2 = vld [vmem:[#allocation13 + $0x10] sm:$0xff]  }
  0xa3   :  { %1063 = vmatprep.subr.bf16.mxu0 %v1489_v0  ;;  %1083 = vmatprep.subr.bf16.mxu1 %v1489_v0  ;;  %v1226_v3 = vld [vmem:[#allocation13 + $0x18] sm:$0xff]   ;;  %v1227_v4 = vld [vmem:[#allocation13 + $0x20] sm:$0xff]   ;;  %v1228_v5 = vld [vmem:[#allocation13 + $0x28] sm:$0xff]  }
  0xa6   :  { %1064 = vmatpush3.bf16.msra.mxu0 %v1178_v7  ;;  %1084 = vmatpush3.bf16.msra.mxu1 %v1187_v12  ;;  %v418_v7 = vshrl.u32 %v417_v6, 7 }
  0xa7   :  { %1065 = vmatprep.subr.bf16.mxu0 %v1489_v0  ;;  %1085 = vmatprep.subr.bf16.mxu1 %v1489_v0 }
  0xa8   :  { %v419_v8 = vsub.s32 0, %v418_v7  ;;  %v423_v10 = vsub.s32 1, %v418_v7 }
  0xaa   :  { %1066 = vmatpush3.bf16.msra.mxu0 %v1179_v9  ;;  %1086 = vmatpush3.bf16.msra.mxu1 %v1188_v14  ;;  %v415_v9 = vld [vmem:[%s1798_s7] sm:$0x3] }
  0xab   :  { %1067 = vmatprep.subr.bf16.mxu0 %v1489_v0  ;;  %1087 = vmatprep.subr.bf16.mxu1 %v1489_v0  ;;  %v424_v12 = vrot.slane %v415_v9, %v423_v10 }
  0xae   :  { %1068 = vmatpush3.bf16.msra.mxu0 %v1180_v11  ;;  %1088 = vmatpush3.bf16.msra.mxu1 %v1189_v16  ;;  %v420_v11 = vrot.slane %v415_v9, %v419_v8 }
  0xaf   :  { %1069 = vmatprep.subr.bf16.mxu0 %v1489_v0  ;;  %1089 = vmatprep.subr.bf16.mxu1 %v1489_v0 }
  0xb2   :  { %1070 = vmatpush3.bf16.msra.mxu0 %v1181_v13  ;;  %1090 = vmatpush3.bf16.msra.mxu1 %v1190_v17 }
  0xb3   :  { %1095 = vmatprep.subr.bf16.mxu1 %v1489_v0  ;;  %507 = vmatprep.subr.bf16.mxu0 %v1193_v19 }
  0xb5   :  { %1072 = vmatmul.mubr.bf16.vlgmr.msra.gmra.mrb[0].mxu0 %v1182_v15 }
  0xb6   :  { %508 = vmatpush1.bf16.msra.mxu0 %v1191_v18  ;;  %539 = vmatprep.mubr.bf16.mxu0 %v1491_v44 }
  0xb7   :  { %509 = vmatprep.subr.bf16.mxu0 %v1196_v20 }
  0xba   :  { %510 = vmatpush1.bf16.msra.mxu0 %v1194_v21 }
  0xbb   :  { %511 = vmatprep.subr.bf16.mxu0 %v1199_v22 }
  0xbe   :  { %512 = vmatpush1.bf16.msra.mxu0 %v1197_v23 }
  0xbf   :  { %513 = vmatprep.subr.bf16.mxu0 %v1202_v24 }
  0xc2   :  { %514 = vmatpush1.bf16.msra.mxu0 %v1200_v25  ;;  %v556_v25 = vld [vmem:[#allocation5] sm:$0xff] }
  0xc3   :  { %515 = vmatprep.subr.bf16.mxu0 %v1205_v26 }
  0xc6   :  { %516 = vmatpush1.bf16.msra.mxu0 %v1203_v27  ;;  %v557_v27 = vld [vmem:[#allocation5 + $0x8] sm:$0xff] }
  0xc7   :  { %517 = vmatprep.subr.bf16.mxu0 %v1208_v28 }
  0xca   :  { %518 = vmatpush1.bf16.msra.mxu0 %v1206_v29 }
  0xcb   :  { %519 = vmatprep.subr.bf16.mxu0 %v1211_v40  ;;  %v1235_v40 = vld [vmem:[#allocation14 + $0x20] sm:$0xff]  }
  0xce   :  { %520 = vmatpush1.bf16.msra.mxu0 %v1209_v41  ;;  %v1236_v41 = vld [vmem:[#allocation14 + $0x28] sm:$0xff]  }
  0xcf   :  { %521 = vmatprep.subr.bf16.mxu0 %v1214_v42  ;;  %v983_v42 = vld [vmem:[%s1800_s9] ss:$0 sm:$0xff]  ;;  %s1492_s9 = smov [#allocation17]  }
  0xd0   :  { %s928_s1 = sshll.u32 %s1492_s9, 4  ;;  %s929_s1 = int_to_ptr.vmem [resolvable:$true] %s928_s1 }
  0xd1   :  { %s1419_s6 = scalar_lea.vmem %s929_s1, 512  ;;  %p1424_p9 = scmp.lt.s32.totalorder %s929_s1, %s929_s1 }
  0xd2   :  { %522 = vmatpush1.bf16.msra.mxu0 %v1212_v43  ;;  %p1420_p8 = scmp.ne.s32.totalorder %s929_s1, %s1419_s6  ;;  %p1425_p10 = scmp.lt.s32.totalorder %s1419_s6, %s1419_s6 }
  0xd3   :  { %1115 = vmatprep.subr.bf16.mxu0 %v1489_v0 }
  0xd4   :  { %p1426_p11 = por %p1425_p10, %p1424_p9 }
  0xd6   :  { %p1427_p12 = pnand %p1426_p11, %p1420_p8 }
 0x188   :  { %v274_v31 = vpop.f32.mrb[0].mxu0 }
 0x189   :  { %v275_v32 = vadd.f32 %v948_v30, %v274_v31  ;;  %v1073_v33 = vpop.f32.mrb[1].mxu0 }
 0x18a   :  { %v277_v34 = vpop.f32.mrb[2].mxu0 }
 0x18b   :  { %v278_v35 = vadd.f32 %v948_v30, %v277_v34  ;;  %v1074_v36 = vpop.f32.mrb[3].mxu0  ;;  %v281_v37 = vmax.f32 %v275_v32, 0.0  ;;  %v1229_v34 = vld [vmem:[#allocation13 + $0x30] sm:$0xff]  }
 0x18c   :  { %v1231_v36 = vld [vmem:[#allocation14] sm:$0xff]  }
 0x18d   :  { %v282_v38 = vmax.f32 %v278_v35, 0.0  ;;  %v1230_v35 = vld [vmem:[#allocation13 + $0x38] sm:$0xff]  }
 0x18f   :  { %v283_v39 = vpack.c.bf16 %v282_v38, %v281_v37  ;;  %v1232_v37 = vld [vmem:[#allocation14 + $0x8] sm:$0xff]   ;;  %v1233_v38 = vld [vmem:[#allocation14 + $0x10] sm:$0xff]  }
 0x191   :  { %1092 = vmatmul.mubr.bf16.vlgmr.msra.gmra.mrb[0].mxu1 %v283_v39  ;;  %v1234_v39 = vld [vmem:[#allocation14 + $0x18] sm:$0xff]  }
 0x192   :  { %1111 = vmatprep.mubr.msk.bf16.mxu1 %vm1490_vm0, %v1489_v0  ;;  %1096 = vmatpush3.bf16.msra.mxu1 %v1215_v45 }
 0x193   :  { %1097 = vmatprep.subr.bf16.mxu1 %v1489_v0 }
 0x196   :  { %1098 = vmatpush3.bf16.msra.mxu1 %v1216_v56 }
 0x197   :  { %1099 = vmatprep.subr.bf16.mxu1 %v1489_v0 }
 0x19a   :  { %1100 = vmatpush3.bf16.msra.mxu1 %v1217_v57 }
 0x19b   :  { %1101 = vmatprep.subr.bf16.mxu1 %v1489_v0 }
 0x19e   :  { %1102 = vmatpush3.bf16.msra.mxu1 %v1218_v58 }
 0x19f   :  { %1103 = vmatprep.subr.bf16.mxu1 %v1489_v0 }
 0x1a2   :  { %1104 = vmatpush3.bf16.msra.mxu1 %v1219_v59 }
 0x1a3   :  { %1105 = vmatprep.subr.bf16.mxu1 %v1489_v0 }
 0x1a6   :  { %1106 = vmatpush3.bf16.msra.mxu1 %v1220_v60 }
 0x1a7   :  { %1107 = vmatprep.subr.bf16.mxu1 %v1489_v0 }
 0x1aa   :  { %1108 = vmatpush3.bf16.msra.mxu1 %v1221_v61 }
 0x1ab   :  { %1109 = vmatprep.subr.bf16.mxu1 %v1489_v0 }
 0x1ae   :  { %1110 = vmatpush3.bf16.msra.mxu1 %v1222_v62 }
 0x1af   :  { %1135 = vmatprep.subr.bf16.mxu1 %v1489_v0 }
 0x264   :  { %v389_v47 = vpop.f32.mrb[0].mxu1 }
 0x265   :  { %v390_v48 = vadd.f32 %v958_v46, %v389_v47  ;;  %v1093_v49 = vpop.f32.mrb[1].mxu1 }
 0x266   :  { %v392_v50 = vpop.f32.mrb[2].mxu1 }
 0x267   :  { %v393_v51 = vadd.f32 %v958_v46, %v392_v50  ;;  %v1094_v52 = vpop.f32.mrb[3].mxu1  ;;  %v396_v53 = vmax.f32 %v390_v48, 0.0 }
 0x268   :  { %v1237_v52 = vld [vmem:[#allocation14 + $0x30] sm:$0xff]  }
 0x269   :  { %v397_v54 = vmax.f32 %v393_v51, 0.0 }
 0x26b   :  { %v398_v55 = vpack.c.bf16 %v397_v54, %v396_v53  ;;  %v1238_v53 = vld [vmem:[#allocation14 + $0x38] sm:$0xff]   ;;  %v992_v54 = vld [vmem:[%s1802_s11] ss:$0 sm:$0xff] }
 0x26d   :  { %540 = vmatmul.mubr.bf16.vlgmr.msra.gmra.mrb[4].mxu0 %v398_v55 }
 0x26e   :  { %1131 = vmatprep.mubr.msk.bf16.mxu0 %vm1490_vm0, %v1489_v0  ;;  %1116 = vmatpush3.bf16.msra.mxu0 %v1223_v63 }
 0x26f   :  { %1117 = vmatprep.subr.bf16.mxu0 %v1489_v0 }
 0x272   :  { %1118 = vmatpush3.bf16.msra.mxu0 %v1224_v1 }
 0x273   :  { %1119 = vmatprep.subr.bf16.mxu0 %v1489_v0 }
 0x276   :  { %1120 = vmatpush3.bf16.msra.mxu0 %v1225_v2 }
 0x277   :  { %1121 = vmatprep.subr.bf16.mxu0 %v1489_v0 }
 0x27a   :  { %1122 = vmatpush3.bf16.msra.mxu0 %v1226_v3 }
 0x27b   :  { %1123 = vmatprep.subr.bf16.mxu0 %v1489_v0 }
 0x27e   :  { %1124 = vmatpush3.bf16.msra.mxu0 %v1227_v4 }
 0x27f   :  { %1125 = vmatprep.subr.bf16.mxu0 %v1489_v0 }
 0x282   :  { %1126 = vmatpush3.bf16.msra.mxu0 %v1228_v5 }
 0x283   :  { %1127 = vmatprep.subr.bf16.mxu0 %v1489_v0 }
 0x286   :  { %1128 = vmatpush3.bf16.msra.mxu0 %v1229_v34 }
 0x287   :  { %1129 = vmatprep.subr.bf16.mxu0 %v1489_v0 }
 0x28a   :  { %1130 = vmatpush3.bf16.msra.mxu0 %v1230_v35 }
 0x340   :  { %v541_v13 = vpop.f32.mrb[4].mxu0 }
 0x341   :  { %v542_v14 = vadd.f32 %v541_v13, %v420_v11  ;;  %v543_v15 = vpop.f32.mrb[5].mxu0 }
 0x342   :  { %v544_v16 = vadd.f32 %v543_v15, %v424_v12  ;;  %v545_v17 = vpop.f32.mrb[6].mxu0 }
 0x343   :  { %907 = vst [vmem:[#allocation17] sm:$0xff] %v542_v14  ;;  %v546_v18 = vadd.f32 %v545_v17, %v420_v11  ;;  %v547_v19 = vpop.f32.mrb[7].mxu0 }
 0x344   :  { %v550_v20 = vmul.f32 0.5, %v544_v16  ;;  %908 = vst [vmem:[#allocation17 + $0x8] sm:$0xff] %v544_v16  ;;  %v548_v21 = vadd.f32 %v547_v19, %v424_v12 }
 0x345   :  { %909 = vst [vmem:[#allocation17 + $0x10] sm:$0xff] %v546_v18 }
 0x346   :  { %v552_v22 = vmul.f32 1.442695, %v550_v20  ;;  %v551_v23 = vmul.f32 0.5, %v548_v21  ;;  %910 = vst [vmem:[#allocation17 + $0x18] sm:$0xff] %v548_v21 }
 0x348   :  { %1239 = vpow2.f32 %v552_v22  ;;  %v554_v24 = vmul.f32 1.442695, %v551_v23 }
 0x34a   :  { %1241 = vpow2.f32 %v554_v24 }
 0x352   :  { %v1240_v26 = vpop.eup %1239 }
 0x353   :  { %v558_v28 = vmul.f32 %v1240_v26, %v556_v25 }
 0x354   :  { %v1242_v29 = vpop.eup %1241 }
 0x355   :  { %v559_v30 = vmul.f32 %v1242_v29, %v557_v27  ;;  %v560_v31 = vadd.f32 %v558_v28, %v542_v14 }
 0x357   :  { %v561_v32 = vadd.f32 %v559_v30, %v546_v18 }
 0x359   :  { %v562_v33 = vpack.c.bf16 %v561_v32, %v560_v31 }
 0x35b   :  { %1112 = vmatmul.mubr.bf16.vlgmr.msra.gmra.mrb[4].mxu1 %v562_v33 }
 0x35c   :  { %1151 = vmatprep.mubr.msk.bf16.mxu1 %vm1490_vm0, %v1489_v0  ;;  %1136 = vmatpush3.bf16.msra.mxu1 %v1231_v36 }
 0x35d   :  { %1137 = vmatprep.subr.bf16.mxu1 %v1489_v0 }
 0x360   :  { %1138 = vmatpush3.bf16.msra.mxu1 %v1232_v37 }
 0x361   :  { %1139 = vmatprep.subr.bf16.mxu1 %v1489_v0 }
 0x364   :  { %1140 = vmatpush3.bf16.msra.mxu1 %v1233_v38 }
 0x365   :  { %1141 = vmatprep.subr.bf16.mxu1 %v1489_v0 }
 0x368   :  { %1142 = vmatpush3.bf16.msra.mxu1 %v1234_v39 }
 0x369   :  { %1143 = vmatprep.subr.bf16.mxu1 %v1489_v0 }
 0x36c   :  { %1144 = vmatpush3.bf16.msra.mxu1 %v1235_v40 }
 0x36d   :  { %1145 = vmatprep.subr.bf16.mxu1 %v1489_v0 }
 0x370   :  { %1146 = vmatpush3.bf16.msra.mxu1 %v1236_v41 }
 0x371   :  { %1147 = vmatprep.subr.bf16.mxu1 %v1489_v0 }
 0x374   :  { %1148 = vmatpush3.bf16.msra.mxu1 %v1237_v52 }
 0x375   :  { %1149 = vmatprep.subr.bf16.mxu1 %v1489_v0 }
 0x378   :  { %1150 = vmatpush3.bf16.msra.mxu1 %v1238_v53 }
 0x42e   :  { %v668_v43 = vpop.f32.mrb[4].mxu1 }
 0x42f   :  { %v669_v44 = vadd.f32 %v983_v42, %v668_v43  ;;  %v1113_v45 = vpop.f32.mrb[5].mxu1 }
 0x430   :  { %v671_v46 = vpop.f32.mrb[6].mxu1 }
 0x431   :  { %v672_v47 = vadd.f32 %v983_v42, %v671_v46  ;;  %v1114_v48 = vpop.f32.mrb[7].mxu1  ;;  %v675_v49 = vmax.f32 %v669_v44, 0.0 }
 0x433   :  { %v676_v50 = vmax.f32 %v672_v47, 0.0 }
 0x435   :  { %v677_v51 = vpack.c.bf16 %v676_v50, %v675_v49 }
 0x437   :  { %1132 = vmatmul.mubr.bf16.vlgmr.msra.gmra.mrb[8].mxu0 %v677_v51 }
 0x50a   :  { %v783_v55 = vpop.f32.mrb[8].mxu0 }
 0x50b   :  { %v784_v56 = vadd.f32 %v992_v54, %v783_v55  ;;  %v1133_v57 = vpop.f32.mrb[9].mxu0 }
 0x50c   :  { %v786_v58 = vpop.f32.mrb[10].mxu0 }
 0x50d   :  { %v787_v59 = vadd.f32 %v992_v54, %v786_v58  ;;  %v1134_v60 = vpop.f32.mrb[11].mxu0  ;;  %v790_v61 = vmax.f32 %v784_v56, 0.0 }
 0x50f   :  { %v791_v62 = vmax.f32 %v787_v59, 0.0 }
 0x511   :  { %v792_v63 = vpack.c.bf16 %v791_v62, %v790_v61 }
 0x513   :  { %1152 = vmatmul.mubr.bf16.vlgmr.msra.gmra.mrb[8].mxu1 %v792_v63 }
 0x514   :  { %1430 = shalt.err (!%p1427_p12)
}
 0x515   :  { %s1431_s17 = scalar_lea.hbm %s1806_s15, 512 }
 0x516   :  { %p1432_p13 = scmp.ne.s32.totalorder %s1806_s15, %s1431_s17  ;;  %p1435_p0 = scmp.lt.u32.totalorder %s1431_s17, %s1806_s15 }
 0x518   :  { %p1437_p1 = pnand %p1435_p0, %p1432_p13 }
 0x51a   :  { %1440 = shalt.err (!%p1437_p1)
}
 0x51b   :  { %s1493_s14 = smov 256   ;;  %s1494_s24 = smov 16   ;;  %v1001_v0 = vld [vmem:[%s1804_s13] ss:$0 sm:$0xff] }
 0x51c   :  { %934 = dma.vmem_to_hbm [thread:$0]  %s929_s1, 512, %s1806_s15, [#allocation18], %s1493_s14, %s1493_s14, %s1494_s24  }
 0x51d   :  { %s1495_s21 = smov [#allocation16]  }
 0x51e   :  { %s916_s12 = sshll.u32 %s1495_s21, 4  ;;  %s917_s12 = int_to_ptr.vmem [resolvable:$true] %s916_s12 }
 0x51f   :  { %s1441_s19 = scalar_lea.vmem %s917_s12, 256  ;;  %p1446_p3 = scmp.lt.s32.totalorder %s917_s12, %s917_s12 }
 0x520   :  { %p1442_p2 = scmp.ne.s32.totalorder %s917_s12, %s1441_s19  ;;  %p1447_p4 = scmp.lt.s32.totalorder %s1441_s19, %s1441_s19 }
 0x522   :  { %p1448_p5 = por %p1447_p4, %p1446_p3 }
 0x524   :  { %p1449_p6 = pnand %p1448_p5, %p1442_p2 }
 0x5e6   :  { %v898_v1 = vpop.f32.mrb[8].mxu1 }
 0x5e7   :  { %v899_v2 = vadd.f32 %v1001_v0, %v898_v1  ;;  %v1153_v3 = vpop.f32.mrb[9].mxu1 }
 0x5e8   :  { %v901_v4 = vpop.f32.mrb[10].mxu1 }
 0x5e9   :  { %905 = vst [vmem:[#allocation16] sm:$0xff] %v899_v2  ;;  %v902_v5 = vadd.f32 %v1001_v0, %v901_v4  ;;  %v1154_v6 = vpop.f32.mrb[11].mxu1 }
 0x5eb   :  { %906 = vst [vmem:[#allocation16 + $0x8] sm:$0xff] %v902_v5 }
 0x5ec   :  { %1452 = shalt.err (!%p1449_p6)
}
 0x5ed   :  { %s1809_s3 = sld [smem:[#allocation26_spill]] }
 0x5f3   :  { %s1453_s30 = scalar_lea.hbm %s1809_s3, 256 }
 0x5f4   :  { %p1454_p7 = scmp.ne.s32.totalorder %s1809_s3, %s1453_s30  ;;  %p1457_p8 = scmp.lt.u32.totalorder %s1453_s30, %s1809_s3 }
 0x5f6   :  { %p1459_p9 = pnand %p1457_p8, %p1454_p7 }
 0x5f8   :  { %1462 = shalt.err (!%p1459_p9)
}
 0x5f9   :  { %922 = dma.vmem_to_hbm [thread:$0]  %s917_s12, 256, %s1809_s3, [#allocation4], %s1478_s28, %s1478_s28, %s1479_s29  }
 0x5fa   :  { %1473 = dma.done.wait [#allocation4], 256  }
 0x5fb   :  { %1474 = vsyncadd [#allocation4], 4294967040 }
 0x5fc   :  { %1475 = dma.done.wait [#allocation18], 512  }
 0x5fd   :  { %1476 = vsyncadd [#allocation18], 4294966784 }
 0x5fe   :  { %941 = vsyncpa [#allocation3], 1 }
 0x5ff   :  { %942 = vsyncpa [#allocation6], 1 }
 0x600   :  { %943 = vsyncpa [#allocation9], 1 }
 0x601   :  { %944 = vsyncpa [#allocation12], 1 }
 0x602   :  { %945 = vsyncpa [#allocation15], 1 }
 0x603   :  { %946 = vsyncpa [#allocation4], 1 }
 0x604   :  { %947 = vsyncpa [#allocation18], 1 }

</bundles_post_ra>
